<compile_context>
chip_gen: v7x
topology: tpu7x:2x2x1
jax: 0.10.0
libtpu: 0.0.40
codegen_flags: <defaults>
</compile_context>

<pallas_src>
import functools
import math

import jax
import jax.numpy as jnp
import numpy as np
from jax.experimental import pallas as pl
from jax.experimental.pallas import tpu as pltpu


# ----------------------------- config ---------------------------------------
VOCAB = 64
BLOCK_SIZE = 16
N_EMBD = 32
N_HEAD = 4
N_LAYER = 2
HEAD_DIM = N_EMBD // N_HEAD
VOCAB_PAD = ((VOCAB + 127) // 128) * 128          # lane-dense logits output
MATMUL_DTYPE = jnp.bfloat16                       # MXU operand dtype
F32 = jnp.float32
NEG_BIG = np.float32(-1e30)                       # finite "masked" constant


# ----------------------------- fused kernel ---------------------------------
def _gpt_fused_kernel(
    x_ref, attn_bias_ref, head_mask_ref,
    ln1_g_ref, ln1_b_ref,
    attn_w_ref, attn_b_ref,
    proj_w_ref, proj_b_ref,
    ln2_g_ref, ln2_b_ref,
    fc_w_ref, fc_b_ref,
    mlp_w_ref, mlp_b_ref,
    lnf_g_ref, lnf_b_ref,
    lm_head_w_ref,
    logits_ref, stream_ref,
    *, n_head,
):
    """Single invocation: full N_LAYER forward for all B*T rows in VMEM."""
    f32 = jnp.float32
    mm = MATMUL_DTYPE
    BT, C = x_ref.shape
    L = ln1_g_ref.shape[0]

    x = x_ref[...].astype(f32)                    # (BT, C)
    attn_bias = attn_bias_ref[...]                # (BT, BT) 0 / -1e30

    def layer_norm(v, g, b):
        mu = jnp.mean(v, axis=-1, keepdims=True)
        ex2 = jnp.mean(v * v, axis=-1, keepdims=True)
        var = ex2 - mu * mu
        return (v - mu) * jax.lax.rsqrt(var + np.float32(1e-5)) * g + b

    stream_pieces = []
    for l in range(L):
        # ---------------- attention sub-block ----------------
        h1 = layer_norm(x, ln1_g_ref[l], ln1_b_ref[l])
        qkv = (jnp.dot(h1.astype(mm), attn_w_ref[l], preferred_element_type=f32)
               + attn_b_ref[l])                                  # (BT, 3C)
        q = qkv[:, :C]                # 1/sqrt(hd) already folded into Q weights
        k = qkv[:, C:2 * C]
        v = qkv[:, 2 * C:3 * C]
        kb = k.astype(mm)

        y = jnp.zeros((BT, C), f32)
        for h in range(n_head):
            hm = head_mask_ref[h]                                # (C,)
            qh = (q * hm).astype(mm)
            s = jax.lax.dot_general(qh, kb, (((1,), (1,)), ((), ())),
                                    preferred_element_type=f32)  # (BT, BT)
            s = s + attn_bias
            mx = jnp.max(s, axis=-1, keepdims=True)
            p = jnp.exp(s - mx)
            p = p * pl.reciprocal(jnp.sum(p, axis=-1, keepdims=True), approx=True)
            vh = (v * hm).astype(mm)
            y = y + jnp.dot(p.astype(mm), vh, preferred_element_type=f32)

        y = (jnp.dot(y.astype(mm), proj_w_ref[l], preferred_element_type=f32)
             + proj_b_ref[l])
        x = x + y

        # ---------------- MLP sub-block ----------------
        sae_in = layer_norm(x, ln2_g_ref[l], ln2_b_ref[l])
        hmid = (jnp.dot(sae_in.astype(mm), fc_w_ref[l], preferred_element_type=f32)
                + fc_b_ref[l])
        # exact (erf) GELU, matching torch.nn.GELU() default, in f32
        hmid = 0.5 * hmid * (1.0 + jax.lax.erf(hmid * np.float32(1.0 / math.sqrt(2.0))))
        sae_out = (jnp.dot(hmid.astype(mm), mlp_w_ref[l], preferred_element_type=f32)
                   + mlp_b_ref[l])
        x = x + sae_out

        stream_pieces += [sae_in, sae_out]

    # final layernorm + tied lm_head (bias-free, pre-padded to 128 lanes)
    xf = layer_norm(x, lnf_g_ref[0], lnf_b_ref[0])
    logits_ref[...] = jnp.dot(xf.astype(mm), lm_head_w_ref[...],
                              preferred_element_type=f32).astype(logits_ref.dtype)
    # one lane-dense store for the whole residual stream (L * 2C = 128 lanes)
    stream_ref[...] = jnp.concatenate(stream_pieces, axis=-1).astype(stream_ref.dtype)


# ----------------------------- parameters -----------------------------------
def init_params(key):
    def normal(k, shape, std=0.02):
        return (std * jax.random.normal(k, shape)).astype(F32)

    keys = jax.random.split(key, 6)
    C = N_EMBD
    wte = normal(keys[0], (VOCAB, C))

    # fused QKV weight (L, C, 3C); fold attention scale into the Q slice
    attn_w = normal(keys[2], (N_LAYER, C, 3 * C))
    attn_b = jnp.zeros((N_LAYER, 3 * C), F32)
    scale = np.float32(1.0 / math.sqrt(HEAD_DIM))
    attn_w = attn_w.at[:, :, :C].multiply(scale)
    attn_b = attn_b.at[:, :C].multiply(scale)

    # TODO(synk): weight tying is realized by a one-time transposed+padded copy
    # of wte; correct for inference, must be re-derived if wte is ever updated.
    lm_head = jnp.zeros((C, VOCAB_PAD), F32).at[:, :VOCAB].set(wte.T)

    return {
        "wte": wte,                                        # embedding (f32 gather)
        "wpe": normal(keys[1], (BLOCK_SIZE, C)),
        "ln1_g": jnp.ones((N_LAYER, C), F32),
        "ln1_b": jnp.zeros((N_LAYER, C), F32),
        "ln2_g": jnp.ones((N_LAYER, C), F32),
        "ln2_b": jnp.zeros((N_LAYER, C), F32),
        "lnf_g": jnp.ones((1, C), F32),
        "lnf_b": jnp.zeros((1, C), F32),
        "attn_w": attn_w.astype(MATMUL_DTYPE),
        "attn_b": attn_b,
        "proj_w": normal(keys[3], (N_LAYER, C, C)).astype(MATMUL_DTYPE),
        "proj_b": jnp.zeros((N_LAYER, C), F32),
        "fc_w": normal(keys[4], (N_LAYER, C, 4 * C)).astype(MATMUL_DTYPE),
        "fc_b": jnp.zeros((N_LAYER, 4 * C), F32),
        "mlp_proj_w": normal(keys[5], (N_LAYER, 4 * C, C)).astype(MATMUL_DTYPE),
        "mlp_proj_b": jnp.zeros((N_LAYER, C), F32),
        "lm_head_w": lm_head.astype(MATMUL_DTYPE),
    }


# ----------------------------- forward --------------------------------------
def _full_spec(a):
    nd = a.ndim
    return pl.BlockSpec(a.shape, lambda i, _nd=nd: (0,) * _nd)


@functools.partial(jax.jit, static_argnames=("get_stream",))
def gpt_forward(params, idx, get_stream=False):
    B, T = idx.shape
    assert T <= BLOCK_SIZE
    C = N_EMBD
    L = params["ln1_g"].shape[0]
    BT = B * T

    # TODO(synk): token/position embedding gather stays in plain JAX (no clean
    # tiny-scale Pallas gather); everything downstream is one fused kernel call.
    tok = jnp.take(params["wte"], idx, axis=0)                   # (B, T, C)
    pos = params["wpe"][:T]                                      # (T, C)
    x = (tok + pos[None, :, :]).astype(F32).reshape(BT, C)       # (B*T, C)

    # Static masks (numpy -> constants): block-diagonal causal additive bias so
    # all B sequences share one score matmul per head, plus per-head lane masks
    # (attention scale already folded into the Q weights at init).
    r = np.arange(BT)
    visible = (r[None, :] <= r[:, None]) & ((r[:, None] // T) == (r[None, :] // T))
    attn_bias = jnp.asarray(np.where(visible, 0.0, NEG_BIG).astype(np.float32))
    lane = np.arange(C)
    head_mask = jnp.asarray(np.stack(
        [((lane >= h * HEAD_DIM) & (lane < (h + 1) * HEAD_DIM)).astype(np.float32)
         for h in range(N_HEAD)]))                               # (n_head, C)

    inputs = (
        x, attn_bias, head_mask,
        params["ln1_g"], params["ln1_b"],
        params["attn_w"], params["attn_b"],
        params["proj_w"], params["proj_b"],
        params["ln2_g"], params["ln2_b"],
        params["fc_w"], params["fc_b"],
        params["mlp_proj_w"], params["mlp_proj_b"],
        params["lnf_g"], params["lnf_b"],
        params["lm_head_w"],
    )

    kernel = functools.partial(_gpt_fused_kernel, n_head=N_HEAD)
    stream_width = L * 2 * C

    logits_p, stream_p = pl.pallas_call(
        kernel,
        out_shape=(
            jax.ShapeDtypeStruct((BT, VOCAB_PAD), F32),
            jax.ShapeDtypeStruct((BT, stream_width), F32),
        ),
        grid=(1,),   # batch folded into one step: no per-step pipeline overhead
        in_specs=[_full_spec(a) for a in inputs],
        out_specs=(
            pl.BlockSpec((BT, VOCAB_PAD), lambda i: (0, 0)),
            pl.BlockSpec((BT, stream_width), lambda i: (0, 0)),
        ),
        compiler_params=pltpu.CompilerParams(
            dimension_semantics=("arbitrary",)),
    )(*inputs)

    logits = logits_p.reshape(B, T, VOCAB_PAD)[:, :, :VOCAB]
    stream = []
    if get_stream:
        sp = stream_p.reshape(B, T, stream_width)
        for l in range(L):
            base = l * 2 * C
            stream.append([sp[..., base:base + C], sp[..., base + C:base + 2 * C]])
    loss = None   # targets=None path of the reference forward
    return logits, loss, stream


# ----------------------------- main ------------------------------------------
if __name__ == "__main__":
    key = jax.random.PRNGKey(0)
    pkey, ikey = jax.random.split(key)
    params = init_params(pkey)

    B, T = 2, 8
    idx = jax.random.randint(ikey, (B, T), 0, VOCAB, dtype=jnp.int32)

    logits, loss, stream = gpt_forward(params, idx, get_stream=True)
    jax.block_until_ready(logits)
    assert logits.shape == (B, T, VOCAB)
    assert loss is None
    assert len(stream) == N_LAYER
    assert stream[0][0].shape == (B, T, N_EMBD)
    assert stream[0][1].shape == (B, T, N_EMBD)
    print("KERNEL_OK")
</pallas_src>

<mosaic_0001>
module attributes {stable_mosaic.version = 11 : i64} {
  func.func @_gpt_fused_kernel(%arg0: i32, %arg1: memref<16x32xf32, #tpu.memory_space<vmem>>, %arg2: memref<16x16xf32, #tpu.memory_space<vmem>>, %arg3: memref<4x32xf32, #tpu.memory_space<vmem>>, %arg4: memref<2x32xf32, #tpu.memory_space<vmem>>, %arg5: memref<2x32xf32, #tpu.memory_space<vmem>>, %arg6: memref<2x32x96xbf16, #tpu.memory_space<vmem>>, %arg7: memref<2x96xf32, #tpu.memory_space<vmem>>, %arg8: memref<2x32x32xbf16, #tpu.memory_space<vmem>>, %arg9: memref<2x32xf32, #tpu.memory_space<vmem>>, %arg10: memref<2x32xf32, #tpu.memory_space<vmem>>, %arg11: memref<2x32xf32, #tpu.memory_space<vmem>>, %arg12: memref<2x32x128xbf16, #tpu.memory_space<vmem>>, %arg13: memref<2x128xf32, #tpu.memory_space<vmem>>, %arg14: memref<2x128x32xbf16, #tpu.memory_space<vmem>>, %arg15: memref<2x32xf32, #tpu.memory_space<vmem>>, %arg16: memref<1x32xf32, #tpu.memory_space<vmem>>, %arg17: memref<1x32xf32, #tpu.memory_space<vmem>>, %arg18: memref<32x128xbf16, #tpu.memory_space<vmem>>, %arg19: memref<16x128xf32, #tpu.memory_space<vmem>>, %arg20: memref<16x128xf32, #tpu.memory_space<vmem>>) attributes {dimension_semantics = [#tpu.dimension_semantics<arbitrary>], iteration_bounds = array<i64: 1>, scalar_prefetch = 0 : i64, scratch_operands = 0 : i64, tpu.core_type = #tpu.core_type<tc>, window_params = [{pipeline_mode = #tpu.pipeline_mode<synchronous>, transform_indices = @transform_0, window_bounds = array<i64: 16, 32>}, {pipeline_mode = #tpu.pipeline_mode<synchronous>, transform_indices = @transform_1, window_bounds = array<i64: 16, 16>}, {pipeline_mode = #tpu.pipeline_mode<synchronous>, transform_indices = @transform_2, window_bounds = array<i64: 4, 32>}, {pipeline_mode = #tpu.pipeline_mode<synchronous>, transform_indices = @transform_3, window_bounds = array<i64: 2, 32>}, {pipeline_mode = #tpu.pipeline_mode<synchronous>, transform_indices = @transform_4, window_bounds = array<i64: 2, 32>}, {pipeline_mode = #tpu.pipeline_mode<synchronous>, transform_indices = @transform_5, window_bounds = array<i64: 2, 32, 96>}, {pipeline_mode = #tpu.pipeline_mode<synchronous>, transform_indices = @transform_6, window_bounds = array<i64: 2, 96>}, {pipeline_mode = #tpu.pipeline_mode<synchronous>, transform_indices = @transform_7, window_bounds = array<i64: 2, 32, 32>}, {pipeline_mode = #tpu.pipeline_mode<synchronous>, transform_indices = @transform_8, window_bounds = array<i64: 2, 32>}, {pipeline_mode = #tpu.pipeline_mode<synchronous>, transform_indices = @transform_9, window_bounds = array<i64: 2, 32>}, {pipeline_mode = #tpu.pipeline_mode<synchronous>, transform_indices = @transform_10, window_bounds = array<i64: 2, 32>}, {pipeline_mode = #tpu.pipeline_mode<synchronous>, transform_indices = @transform_11, window_bounds = array<i64: 2, 32, 128>}, {pipeline_mode = #tpu.pipeline_mode<synchronous>, transform_indices = @transform_12, window_bounds = array<i64: 2, 128>}, {pipeline_mode = #tpu.pipeline_mode<synchronous>, transform_indices = @transform_13, window_bounds = array<i64: 2, 128, 32>}, {pipeline_mode = #tpu.pipeline_mode<synchronous>, transform_indices = @transform_14, window_bounds = array<i64: 2, 32>}, {pipeline_mode = #tpu.pipeline_mode<synchronous>, transform_indices = @transform_15, window_bounds = array<i64: 1, 32>}, {pipeline_mode = #tpu.pipeline_mode<synchronous>, transform_indices = @transform_16, window_bounds = array<i64: 1, 32>}, {pipeline_mode = #tpu.pipeline_mode<synchronous>, transform_indices = @transform_17, window_bounds = array<i64: 32, 128>}, {pipeline_mode = #tpu.pipeline_mode<synchronous>, transform_indices = @transform_18, window_bounds = array<i64: 16, 128>}, {pipeline_mode = #tpu.pipeline_mode<synchronous>, transform_indices = @transform_19, window_bounds = array<i64: 16, 128>}]} {
    %c0 = arith.constant 0 : index
    %c0_0 = arith.constant 0 : index
    %0 = vector.load %arg1[%c0, %c0_0] : memref<16x32xf32, #tpu.memory_space<vmem>>, vector<16x32xf32>
    %c0_1 = arith.constant 0 : index
    %c0_2 = arith.constant 0 : index
    %1 = vector.load %arg2[%c0_1, %c0_2] : memref<16x16xf32, #tpu.memory_space<vmem>>, vector<16x16xf32>
    %c0_3 = arith.constant 0 : index
    %c0_4 = arith.constant 0 : index
    %2 = vector.load %arg4[%c0_3, %c0_4] : memref<2x32xf32, #tpu.memory_space<vmem>>, vector<1x32xf32>
    %3 = vector.shape_cast %2 : vector<1x32xf32> to vector<32xf32>
    %c0_5 = arith.constant 0 : index
    %c0_6 = arith.constant 0 : index
    %4 = vector.load %arg5[%c0_5, %c0_6] : memref<2x32xf32, #tpu.memory_space<vmem>>, vector<1x32xf32>
    %5 = vector.shape_cast %4 : vector<1x32xf32> to vector<32xf32>
    %cst = arith.constant dense<0.000000e+00> : vector<16xf32>
    %6 = vector.multi_reduction <add>, %0, %cst [1] : vector<16x32xf32> to vector<16xf32>
    %7 = vector.shape_cast %6 : vector<16xf32> to vector<16x1xf32>
    %cst_7 = arith.constant 3.200000e+01 : f32
    %8 = vector.broadcast %cst_7 : f32 to vector<16x1xf32>
    %9 = arith.divf %7, %8 : vector<16x1xf32>
    %10 = arith.mulf %0, %0 : vector<16x32xf32>
    %cst_8 = arith.constant dense<0.000000e+00> : vector<16xf32>
    %11 = vector.multi_reduction <add>, %10, %cst_8 [1] : vector<16x32xf32> to vector<16xf32>
    %12 = vector.shape_cast %11 : vector<16xf32> to vector<16x1xf32>
    %cst_9 = arith.constant 3.200000e+01 : f32
    %13 = vector.broadcast %cst_9 : f32 to vector<16x1xf32>
    %14 = arith.divf %12, %13 : vector<16x1xf32>
    %15 = arith.mulf %9, %9 : vector<16x1xf32>
    %16 = arith.subf %14, %15 : vector<16x1xf32>
    %17 = vector.broadcast %9 : vector<16x1xf32> to vector<16x32xf32>
    %18 = arith.subf %0, %17 : vector<16x32xf32>
    %cst_10 = arith.constant 9.99999974E-6 : f32
    %19 = vector.broadcast %cst_10 : f32 to vector<16x1xf32>
    %20 = arith.addf %16, %19 : vector<16x1xf32>
    %21 = math.rsqrt %20 : vector<16x1xf32>
    %22 = vector.broadcast %21 : vector<16x1xf32> to vector<16x32xf32>
    %23 = arith.mulf %18, %22 : vector<16x32xf32>
    %24 = vector.shape_cast %3 : vector<32xf32> to vector<1x32xf32>
    %25 = vector.broadcast %24 : vector<1x32xf32> to vector<16x32xf32>
    %26 = arith.mulf %23, %25 : vector<16x32xf32>
    %27 = vector.shape_cast %5 : vector<32xf32> to vector<1x32xf32>
    %28 = vector.broadcast %27 : vector<1x32xf32> to vector<16x32xf32>
    %29 = arith.addf %26, %28 : vector<16x32xf32>
    %30 = arith.truncf %29 : vector<16x32xf32> to vector<16x32xbf16>
    %c0_11 = arith.constant 0 : index
    %c0_12 = arith.constant 0 : index
    %c0_13 = arith.constant 0 : index
    %31 = vector.load %arg6[%c0_11, %c0_12, %c0_13] : memref<2x32x96xbf16, #tpu.memory_space<vmem>>, vector<1x32x96xbf16>
    %32 = vector.shape_cast %31 : vector<1x32x96xbf16> to vector<32x96xbf16>
    %cst_14 = arith.constant dense<0.000000e+00> : vector<16x96xf32>
    %33 = tpu.matmul %30, %32, %cst_14 {dimension_numbers = #tpu.dot_dimension_numbers<[1], [0], [0], [1], [0, 0, 1, 1], [], []>} : vector<16x32xbf16>, vector<32x96xbf16>, vector<16x96xf32> -> vector<16x96xf32>
    %c0_15 = arith.constant 0 : index
    %c0_16 = arith.constant 0 : index
    %34 = vector.load %arg7[%c0_15, %c0_16] : memref<2x96xf32, #tpu.memory_space<vmem>>, vector<1x96xf32>
    %35 = vector.shape_cast %34 : vector<1x96xf32> to vector<96xf32>
    %36 = vector.shape_cast %35 : vector<96xf32> to vector<1x96xf32>
    %37 = vector.broadcast %36 : vector<1x96xf32> to vector<16x96xf32>
    %38 = arith.addf %33, %37 : vector<16x96xf32>
    %39 = vector.extract_strided_slice %38 {offsets = [0, 0], sizes = [16, 32], strides = [1, 1]} : vector<16x96xf32> to vector<16x32xf32>
    %40 = vector.extract_strided_slice %38 {offsets = [0, 32], sizes = [16, 32], strides = [1, 1]} : vector<16x96xf32> to vector<16x32xf32>
    %41 = vector.extract_strided_slice %38 {offsets = [0, 64], sizes = [16, 32], strides = [1, 1]} : vector<16x96xf32> to vector<16x32xf32>
    %42 = arith.truncf %40 : vector<16x32xf32> to vector<16x32xbf16>
    %cst_17 = arith.constant 0.000000e+00 : f32
    %43 = vector.broadcast %cst_17 : f32 to vector<16x32xf32>
    %c0_18 = arith.constant 0 : index
    %c0_19 = arith.constant 0 : index
    %44 = vector.load %arg3[%c0_18, %c0_19] : memref<4x32xf32, #tpu.memory_space<vmem>>, vector<1x32xf32>
    %45 = vector.shape_cast %44 : vector<1x32xf32> to vector<32xf32>
    %46 = vector.shape_cast %45 : vector<32xf32> to vector<1x32xf32>
    %47 = vector.broadcast %46 : vector<1x32xf32> to vector<16x32xf32>
    %48 = arith.mulf %39, %47 : vector<16x32xf32>
    %49 = arith.truncf %48 : vector<16x32xf32> to vector<16x32xbf16>
    %cst_20 = arith.constant dense<0.000000e+00> : vector<16x16xf32>
    %50 = tpu.matmul %49, %42, %cst_20 {dimension_numbers = #tpu.dot_dimension_numbers<[1], [1], [0], [0], [0, 0, 1, 0], [], []>} : vector<16x32xbf16>, vector<16x32xbf16>, vector<16x16xf32> -> vector<16x16xf32>
    %51 = arith.addf %50, %1 : vector<16x16xf32>
    %cst_21 = arith.constant dense<0xFF800000> : vector<16xf32>
    %52 = vector.multi_reduction <maximumf>, %51, %cst_21 [1] : vector<16x16xf32> to vector<16xf32>
    %53 = vector.shape_cast %52 : vector<16xf32> to vector<16x1xf32>
    %54 = vector.broadcast %53 : vector<16x1xf32> to vector<16x16xf32>
    %55 = arith.subf %51, %54 : vector<16x16xf32>
    %56 = math.exp %55 : vector<16x16xf32>
    %cst_22 = arith.constant dense<0.000000e+00> : vector<16xf32>
    %57 = vector.multi_reduction <add>, %56, %cst_22 [1] : vector<16x16xf32> to vector<16xf32>
    %58 = vector.shape_cast %57 : vector<16xf32> to vector<16x1xf32>
    %59 = tpu.reciprocal %58 {approx = true} : vector<16x1xf32> -> vector<16x1xf32>
    %60 = vector.broadcast %59 : vector<16x1xf32> to vector<16x16xf32>
    %61 = arith.mulf %56, %60 : vector<16x16xf32>
    %62 = vector.shape_cast %45 : vector<32xf32> to vector<1x32xf32>
    %63 = vector.broadcast %62 : vector<1x32xf32> to vector<16x32xf32>
    %64 = arith.mulf %41, %63 : vector<16x32xf32>
    %65 = arith.truncf %64 : vector<16x32xf32> to vector<16x32xbf16>
    %66 = arith.truncf %61 : vector<16x16xf32> to vector<16x16xbf16>
    %cst_23 = arith.constant dense<0.000000e+00> : vector<16x32xf32>
    %67 = tpu.matmul %66, %65, %cst_23 {dimension_numbers = #tpu.dot_dimension_numbers<[1], [0], [0], [1], [0, 0, 1, 1], [], []>} : vector<16x16xbf16>, vector<16x32xbf16>, vector<16x32xf32> -> vector<16x32xf32>
    %68 = arith.addf %43, %67 : vector<16x32xf32>
    %c1 = arith.constant 1 : index
    %c0_24 = arith.constant 0 : index
    %69 = vector.load %arg3[%c1, %c0_24] : memref<4x32xf32, #tpu.memory_space<vmem>>, vector<1x32xf32>
    %70 = vector.shape_cast %69 : vector<1x32xf32> to vector<32xf32>
    %71 = vector.shape_cast %70 : vector<32xf32> to vector<1x32xf32>
    %72 = vector.broadcast %71 : vector<1x32xf32> to vector<16x32xf32>
    %73 = arith.mulf %39, %72 : vector<16x32xf32>
    %74 = arith.truncf %73 : vector<16x32xf32> to vector<16x32xbf16>
    %cst_25 = arith.constant dense<0.000000e+00> : vector<16x16xf32>
    %75 = tpu.matmul %74, %42, %cst_25 {dimension_numbers = #tpu.dot_dimension_numbers<[1], [1], [0], [0], [0, 0, 1, 0], [], []>} : vector<16x32xbf16>, vector<16x32xbf16>, vector<16x16xf32> -> vector<16x16xf32>
    %76 = arith.addf %75, %1 : vector<16x16xf32>
    %cst_26 = arith.constant dense<0xFF800000> : vector<16xf32>
    %77 = vector.multi_reduction <maximumf>, %76, %cst_26 [1] : vector<16x16xf32> to vector<16xf32>
    %78 = vector.shape_cast %77 : vector<16xf32> to vector<16x1xf32>
    %79 = vector.broadcast %78 : vector<16x1xf32> to vector<16x16xf32>
    %80 = arith.subf %76, %79 : vector<16x16xf32>
    %81 = math.exp %80 : vector<16x16xf32>
    %cst_27 = arith.constant dense<0.000000e+00> : vector<16xf32>
    %82 = vector.multi_reduction <add>, %81, %cst_27 [1] : vector<16x16xf32> to vector<16xf32>
    %83 = vector.shape_cast %82 : vector<16xf32> to vector<16x1xf32>
    %84 = tpu.reciprocal %83 {approx = true} : vector<16x1xf32> -> vector<16x1xf32>
    %85 = vector.broadcast %84 : vector<16x1xf32> to vector<16x16xf32>
    %86 = arith.mulf %81, %85 : vector<16x16xf32>
    %87 = vector.shape_cast %70 : vector<32xf32> to vector<1x32xf32>
    %88 = vector.broadcast %87 : vector<1x32xf32> to vector<16x32xf32>
    %89 = arith.mulf %41, %88 : vector<16x32xf32>
    %90 = arith.truncf %89 : vector<16x32xf32> to vector<16x32xbf16>
    %91 = arith.truncf %86 : vector<16x16xf32> to vector<16x16xbf16>
    %cst_28 = arith.constant dense<0.000000e+00> : vector<16x32xf32>
    %92 = tpu.matmul %91, %90, %cst_28 {dimension_numbers = #tpu.dot_dimension_numbers<[1], [0], [0], [1], [0, 0, 1, 1], [], []>} : vector<16x16xbf16>, vector<16x32xbf16>, vector<16x32xf32> -> vector<16x32xf32>
    %93 = arith.addf %68, %92 : vector<16x32xf32>
    %c2 = arith.constant 2 : index
    %c0_29 = arith.constant 0 : index
    %94 = vector.load %arg3[%c2, %c0_29] : memref<4x32xf32, #tpu.memory_space<vmem>>, vector<1x32xf32>
    %95 = vector.shape_cast %94 : vector<1x32xf32> to vector<32xf32>
    %96 = vector.shape_cast %95 : vector<32xf32> to vector<1x32xf32>
    %97 = vector.broadcast %96 : vector<1x32xf32> to vector<16x32xf32>
    %98 = arith.mulf %39, %97 : vector<16x32xf32>
    %99 = arith.truncf %98 : vector<16x32xf32> to vector<16x32xbf16>
    %cst_30 = arith.constant dense<0.000000e+00> : vector<16x16xf32>
    %100 = tpu.matmul %99, %42, %cst_30 {dimension_numbers = #tpu.dot_dimension_numbers<[1], [1], [0], [0], [0, 0, 1, 0], [], []>} : vector<16x32xbf16>, vector<16x32xbf16>, vector<16x16xf32> -> vector<16x16xf32>
    %101 = arith.addf %100, %1 : vector<16x16xf32>
    %cst_31 = arith.constant dense<0xFF800000> : vector<16xf32>
    %102 = vector.multi_reduction <maximumf>, %101, %cst_31 [1] : vector<16x16xf32> to vector<16xf32>
    %103 = vector.shape_cast %102 : vector<16xf32> to vector<16x1xf32>
    %104 = vector.broadcast %103 : vector<16x1xf32> to vector<16x16xf32>
    %105 = arith.subf %101, %104 : vector<16x16xf32>
    %106 = math.exp %105 : vector<16x16xf32>
    %cst_32 = arith.constant dense<0.000000e+00> : vector<16xf32>
    %107 = vector.multi_reduction <add>, %106, %cst_32 [1] : vector<16x16xf32> to vector<16xf32>
    %108 = vector.shape_cast %107 : vector<16xf32> to vector<16x1xf32>
    %109 = tpu.reciprocal %108 {approx = true} : vector<16x1xf32> -> vector<16x1xf32>
    %110 = vector.broadcast %109 : vector<16x1xf32> to vector<16x16xf32>
    %111 = arith.mulf %106, %110 : vector<16x16xf32>
    %112 = vector.shape_cast %95 : vector<32xf32> to vector<1x32xf32>
    %113 = vector.broadcast %112 : vector<1x32xf32> to vector<16x32xf32>
    %114 = arith.mulf %41, %113 : vector<16x32xf32>
    %115 = arith.truncf %114 : vector<16x32xf32> to vector<16x32xbf16>
    %116 = arith.truncf %111 : vector<16x16xf32> to vector<16x16xbf16>
    %cst_33 = arith.constant dense<0.000000e+00> : vector<16x32xf32>
    %117 = tpu.matmul %116, %115, %cst_33 {dimension_numbers = #tpu.dot_dimension_numbers<[1], [0], [0], [1], [0, 0, 1, 1], [], []>} : vector<16x16xbf16>, vector<16x32xbf16>, vector<16x32xf32> -> vector<16x32xf32>
    %118 = arith.addf %93, %117 : vector<16x32xf32>
    %c3 = arith.constant 3 : index
    %c0_34 = arith.constant 0 : index
    %119 = vector.load %arg3[%c3, %c0_34] : memref<4x32xf32, #tpu.memory_space<vmem>>, vector<1x32xf32>
    %120 = vector.shape_cast %119 : vector<1x32xf32> to vector<32xf32>
    %121 = vector.shape_cast %120 : vector<32xf32> to vector<1x32xf32>
    %122 = vector.broadcast %121 : vector<1x32xf32> to vector<16x32xf32>
    %123 = arith.mulf %39, %122 : vector<16x32xf32>
    %124 = arith.truncf %123 : vector<16x32xf32> to vector<16x32xbf16>
    %cst_35 = arith.constant dense<0.000000e+00> : vector<16x16xf32>
    %125 = tpu.matmul %124, %42, %cst_35 {dimension_numbers = #tpu.dot_dimension_numbers<[1], [1], [0], [0], [0, 0, 1, 0], [], []>} : vector<16x32xbf16>, vector<16x32xbf16>, vector<16x16xf32> -> vector<16x16xf32>
    %126 = arith.addf %125, %1 : vector<16x16xf32>
    %cst_36 = arith.constant dense<0xFF800000> : vector<16xf32>
    %127 = vector.multi_reduction <maximumf>, %126, %cst_36 [1] : vector<16x16xf32> to vector<16xf32>
    %128 = vector.shape_cast %127 : vector<16xf32> to vector<16x1xf32>
    %129 = vector.broadcast %128 : vector<16x1xf32> to vector<16x16xf32>
    %130 = arith.subf %126, %129 : vector<16x16xf32>
    %131 = math.exp %130 : vector<16x16xf32>
    %cst_37 = arith.constant dense<0.000000e+00> : vector<16xf32>
    %132 = vector.multi_reduction <add>, %131, %cst_37 [1] : vector<16x16xf32> to vector<16xf32>
    %133 = vector.shape_cast %132 : vector<16xf32> to vector<16x1xf32>
    %134 = tpu.reciprocal %133 {approx = true} : vector<16x1xf32> -> vector<16x1xf32>
    %135 = vector.broadcast %134 : vector<16x1xf32> to vector<16x16xf32>
    %136 = arith.mulf %131, %135 : vector<16x16xf32>
    %137 = vector.shape_cast %120 : vector<32xf32> to vector<1x32xf32>
    %138 = vector.broadcast %137 : vector<1x32xf32> to vector<16x32xf32>
    %139 = arith.mulf %41, %138 : vector<16x32xf32>
    %140 = arith.truncf %139 : vector<16x32xf32> to vector<16x32xbf16>
    %141 = arith.truncf %136 : vector<16x16xf32> to vector<16x16xbf16>
    %cst_38 = arith.constant dense<0.000000e+00> : vector<16x32xf32>
    %142 = tpu.matmul %141, %140, %cst_38 {dimension_numbers = #tpu.dot_dimension_numbers<[1], [0], [0], [1], [0, 0, 1, 1], [], []>} : vector<16x16xbf16>, vector<16x32xbf16>, vector<16x32xf32> -> vector<16x32xf32>
    %143 = arith.addf %118, %142 : vector<16x32xf32>
    %144 = arith.truncf %143 : vector<16x32xf32> to vector<16x32xbf16>
    %c0_39 = arith.constant 0 : index
    %c0_40 = arith.constant 0 : index
    %c0_41 = arith.constant 0 : index
    %145 = vector.load %arg8[%c0_39, %c0_40, %c0_41] : memref<2x32x32xbf16, #tpu.memory_space<vmem>>, vector<1x32x32xbf16>
    %146 = vector.shape_cast %145 : vector<1x32x32xbf16> to vector<32x32xbf16>
    %cst_42 = arith.constant dense<0.000000e+00> : vector<16x32xf32>
    %147 = tpu.matmul %144, %146, %cst_42 {dimension_numbers = #tpu.dot_dimension_numbers<[1], [0], [0], [1], [0, 0, 1, 1], [], []>} : vector<16x32xbf16>, vector<32x32xbf16>, vector<16x32xf32> -> vector<16x32xf32>
    %c0_43 = arith.constant 0 : index
    %c0_44 = arith.constant 0 : index
    %148 = vector.load %arg9[%c0_43, %c0_44] : memref<2x32xf32, #tpu.memory_space<vmem>>, vector<1x32xf32>
    %149 = vector.shape_cast %148 : vector<1x32xf32> to vector<32xf32>
    %150 = vector.shape_cast %149 : vector<32xf32> to vector<1x32xf32>
    %151 = vector.broadcast %150 : vector<1x32xf32> to vector<16x32xf32>
    %152 = arith.addf %147, %151 : vector<16x32xf32>
    %153 = arith.addf %0, %152 : vector<16x32xf32>
    %c0_45 = arith.constant 0 : index
    %c0_46 = arith.constant 0 : index
    %154 = vector.load %arg10[%c0_45, %c0_46] : memref<2x32xf32, #tpu.memory_space<vmem>>, vector<1x32xf32>
    %155 = vector.shape_cast %154 : vector<1x32xf32> to vector<32xf32>
    %c0_47 = arith.constant 0 : index
    %c0_48 = arith.constant 0 : index
    %156 = vector.load %arg11[%c0_47, %c0_48] : memref<2x32xf32, #tpu.memory_space<vmem>>, vector<1x32xf32>
    %157 = vector.shape_cast %156 : vector<1x32xf32> to vector<32xf32>
    %cst_49 = arith.constant dense<0.000000e+00> : vector<16xf32>
    %158 = vector.multi_reduction <add>, %153, %cst_49 [1] : vector<16x32xf32> to vector<16xf32>
    %159 = vector.shape_cast %158 : vector<16xf32> to vector<16x1xf32>
    %cst_50 = arith.constant 3.200000e+01 : f32
    %160 = vector.broadcast %cst_50 : f32 to vector<16x1xf32>
    %161 = arith.divf %159, %160 : vector<16x1xf32>
    %162 = arith.mulf %153, %153 : vector<16x32xf32>
    %cst_51 = arith.constant dense<0.000000e+00> : vector<16xf32>
    %163 = vector.multi_reduction <add>, %162, %cst_51 [1] : vector<16x32xf32> to vector<16xf32>
    %164 = vector.shape_cast %163 : vector<16xf32> to vector<16x1xf32>
    %cst_52 = arith.constant 3.200000e+01 : f32
    %165 = vector.broadcast %cst_52 : f32 to vector<16x1xf32>
    %166 = arith.divf %164, %165 : vector<16x1xf32>
    %167 = arith.mulf %161, %161 : vector<16x1xf32>
    %168 = arith.subf %166, %167 : vector<16x1xf32>
    %169 = vector.broadcast %161 : vector<16x1xf32> to vector<16x32xf32>
    %170 = arith.subf %153, %169 : vector<16x32xf32>
    %cst_53 = arith.constant 9.99999974E-6 : f32
    %171 = vector.broadcast %cst_53 : f32 to vector<16x1xf32>
    %172 = arith.addf %168, %171 : vector<16x1xf32>
    %173 = math.rsqrt %172 : vector<16x1xf32>
    %174 = vector.broadcast %173 : vector<16x1xf32> to vector<16x32xf32>
    %175 = arith.mulf %170, %174 : vector<16x32xf32>
    %176 = vector.shape_cast %155 : vector<32xf32> to vector<1x32xf32>
    %177 = vector.broadcast %176 : vector<1x32xf32> to vector<16x32xf32>
    %178 = arith.mulf %175, %177 : vector<16x32xf32>
    %179 = vector.shape_cast %157 : vector<32xf32> to vector<1x32xf32>
    %180 = vector.broadcast %179 : vector<1x32xf32> to vector<16x32xf32>
    %181 = arith.addf %178, %180 : vector<16x32xf32>
    %182 = arith.truncf %181 : vector<16x32xf32> to vector<16x32xbf16>
    %c0_54 = arith.constant 0 : index
    %c0_55 = arith.constant 0 : index
    %c0_56 = arith.constant 0 : index
    %183 = vector.load %arg12[%c0_54, %c0_55, %c0_56] : memref<2x32x128xbf16, #tpu.memory_space<vmem>>, vector<1x32x128xbf16>
    %184 = vector.shape_cast %183 : vector<1x32x128xbf16> to vector<32x128xbf16>
    %cst_57 = arith.constant dense<0.000000e+00> : vector<16x128xf32>
    %185 = tpu.matmul %182, %184, %cst_57 {dimension_numbers = #tpu.dot_dimension_numbers<[1], [0], [0], [1], [0, 0, 1, 1], [], []>} : vector<16x32xbf16>, vector<32x128xbf16>, vector<16x128xf32> -> vector<16x128xf32>
    %c0_58 = arith.constant 0 : index
    %c0_59 = arith.constant 0 : index
    %186 = vector.load %arg13[%c0_58, %c0_59] : memref<2x128xf32, #tpu.memory_space<vmem>>, vector<1x128xf32>
    %187 = vector.shape_cast %186 : vector<1x128xf32> to vector<128xf32>
    %188 = vector.shape_cast %187 : vector<128xf32> to vector<1x128xf32>
    %189 = vector.broadcast %188 : vector<1x128xf32> to vector<16x128xf32>
    %190 = arith.addf %185, %189 : vector<16x128xf32>
    %cst_60 = arith.constant 5.000000e-01 : f32
    %191 = vector.broadcast %cst_60 : f32 to vector<16x128xf32>
    %192 = arith.mulf %191, %190 : vector<16x128xf32>
    %cst_61 = arith.constant 0.707106769 : f32
    %193 = vector.broadcast %cst_61 : f32 to vector<16x128xf32>
    %194 = arith.mulf %190, %193 : vector<16x128xf32>
    %195 = math.erf %194 : vector<16x128xf32>
    %cst_62 = arith.constant 1.000000e+00 : f32
    %196 = vector.broadcast %cst_62 : f32 to vector<16x128xf32>
    %197 = arith.addf %196, %195 : vector<16x128xf32>
    %198 = arith.mulf %192, %197 : vector<16x128xf32>
    %199 = arith.truncf %198 : vector<16x128xf32> to vector<16x128xbf16>
    %c0_63 = arith.constant 0 : index
    %c0_64 = arith.constant 0 : index
    %c0_65 = arith.constant 0 : index
    %200 = vector.load %arg14[%c0_63, %c0_64, %c0_65] : memref<2x128x32xbf16, #tpu.memory_space<vmem>>, vector<1x128x32xbf16>
    %201 = vector.shape_cast %200 : vector<1x128x32xbf16> to vector<128x32xbf16>
    %cst_66 = arith.constant dense<0.000000e+00> : vector<16x32xf32>
    %202 = tpu.matmul %199, %201, %cst_66 {dimension_numbers = #tpu.dot_dimension_numbers<[1], [0], [0], [1], [0, 0, 1, 1], [], []>} : vector<16x128xbf16>, vector<128x32xbf16>, vector<16x32xf32> -> vector<16x32xf32>
    %c0_67 = arith.constant 0 : index
    %c0_68 = arith.constant 0 : index
    %203 = vector.load %arg15[%c0_67, %c0_68] : memref<2x32xf32, #tpu.memory_space<vmem>>, vector<1x32xf32>
    %204 = vector.shape_cast %203 : vector<1x32xf32> to vector<32xf32>
    %205 = vector.shape_cast %204 : vector<32xf32> to vector<1x32xf32>
    %206 = vector.broadcast %205 : vector<1x32xf32> to vector<16x32xf32>
    %207 = arith.addf %202, %206 : vector<16x32xf32>
    %208 = arith.addf %153, %207 : vector<16x32xf32>
    %c1_69 = arith.constant 1 : index
    %c0_70 = arith.constant 0 : index
    %209 = vector.load %arg4[%c1_69, %c0_70] : memref<2x32xf32, #tpu.memory_space<vmem>>, vector<1x32xf32>
    %210 = vector.shape_cast %209 : vector<1x32xf32> to vector<32xf32>
    %c1_71 = arith.constant 1 : index
    %c0_72 = arith.constant 0 : index
    %211 = vector.load %arg5[%c1_71, %c0_72] : memref<2x32xf32, #tpu.memory_space<vmem>>, vector<1x32xf32>
    %212 = vector.shape_cast %211 : vector<1x32xf32> to vector<32xf32>
    %cst_73 = arith.constant dense<0.000000e+00> : vector<16xf32>
    %213 = vector.multi_reduction <add>, %208, %cst_73 [1] : vector<16x32xf32> to vector<16xf32>
    %214 = vector.shape_cast %213 : vector<16xf32> to vector<16x1xf32>
    %cst_74 = arith.constant 3.200000e+01 : f32
    %215 = vector.broadcast %cst_74 : f32 to vector<16x1xf32>
    %216 = arith.divf %214, %215 : vector<16x1xf32>
    %217 = arith.mulf %208, %208 : vector<16x32xf32>
    %cst_75 = arith.constant dense<0.000000e+00> : vector<16xf32>
    %218 = vector.multi_reduction <add>, %217, %cst_75 [1] : vector<16x32xf32> to vector<16xf32>
    %219 = vector.shape_cast %218 : vector<16xf32> to vector<16x1xf32>
    %cst_76 = arith.constant 3.200000e+01 : f32
    %220 = vector.broadcast %cst_76 : f32 to vector<16x1xf32>
    %221 = arith.divf %219, %220 : vector<16x1xf32>
    %222 = arith.mulf %216, %216 : vector<16x1xf32>
    %223 = arith.subf %221, %222 : vector<16x1xf32>
    %224 = vector.broadcast %216 : vector<16x1xf32> to vector<16x32xf32>
    %225 = arith.subf %208, %224 : vector<16x32xf32>
    %cst_77 = arith.constant 9.99999974E-6 : f32
    %226 = vector.broadcast %cst_77 : f32 to vector<16x1xf32>
    %227 = arith.addf %223, %226 : vector<16x1xf32>
    %228 = math.rsqrt %227 : vector<16x1xf32>
    %229 = vector.broadcast %228 : vector<16x1xf32> to vector<16x32xf32>
    %230 = arith.mulf %225, %229 : vector<16x32xf32>
    %231 = vector.shape_cast %210 : vector<32xf32> to vector<1x32xf32>
    %232 = vector.broadcast %231 : vector<1x32xf32> to vector<16x32xf32>
    %233 = arith.mulf %230, %232 : vector<16x32xf32>
    %234 = vector.shape_cast %212 : vector<32xf32> to vector<1x32xf32>
    %235 = vector.broadcast %234 : vector<1x32xf32> to vector<16x32xf32>
    %236 = arith.addf %233, %235 : vector<16x32xf32>
    %237 = arith.truncf %236 : vector<16x32xf32> to vector<16x32xbf16>
    %c1_78 = arith.constant 1 : index
    %c0_79 = arith.constant 0 : index
    %c0_80 = arith.constant 0 : index
    %238 = vector.load %arg6[%c1_78, %c0_79, %c0_80] : memref<2x32x96xbf16, #tpu.memory_space<vmem>>, vector<1x32x96xbf16>
    %239 = vector.shape_cast %238 : vector<1x32x96xbf16> to vector<32x96xbf16>
    %cst_81 = arith.constant dense<0.000000e+00> : vector<16x96xf32>
    %240 = tpu.matmul %237, %239, %cst_81 {dimension_numbers = #tpu.dot_dimension_numbers<[1], [0], [0], [1], [0, 0, 1, 1], [], []>} : vector<16x32xbf16>, vector<32x96xbf16>, vector<16x96xf32> -> vector<16x96xf32>
    %c1_82 = arith.constant 1 : index
    %c0_83 = arith.constant 0 : index
    %241 = vector.load %arg7[%c1_82, %c0_83] : memref<2x96xf32, #tpu.memory_space<vmem>>, vector<1x96xf32>
    %242 = vector.shape_cast %241 : vector<1x96xf32> to vector<96xf32>
    %243 = vector.shape_cast %242 : vector<96xf32> to vector<1x96xf32>
    %244 = vector.broadcast %243 : vector<1x96xf32> to vector<16x96xf32>
    %245 = arith.addf %240, %244 : vector<16x96xf32>
    %246 = vector.extract_strided_slice %245 {offsets = [0, 0], sizes = [16, 32], strides = [1, 1]} : vector<16x96xf32> to vector<16x32xf32>
    %247 = vector.extract_strided_slice %245 {offsets = [0, 32], sizes = [16, 32], strides = [1, 1]} : vector<16x96xf32> to vector<16x32xf32>
    %248 = vector.extract_strided_slice %245 {offsets = [0, 64], sizes = [16, 32], strides = [1, 1]} : vector<16x96xf32> to vector<16x32xf32>
    %249 = arith.truncf %247 : vector<16x32xf32> to vector<16x32xbf16>
    %cst_84 = arith.constant 0.000000e+00 : f32
    %250 = vector.broadcast %cst_84 : f32 to vector<16x32xf32>
    %c0_85 = arith.constant 0 : index
    %c0_86 = arith.constant 0 : index
    %251 = vector.load %arg3[%c0_85, %c0_86] : memref<4x32xf32, #tpu.memory_space<vmem>>, vector<1x32xf32>
    %252 = vector.shape_cast %251 : vector<1x32xf32> to vector<32xf32>
    %253 = vector.shape_cast %252 : vector<32xf32> to vector<1x32xf32>
    %254 = vector.broadcast %253 : vector<1x32xf32> to vector<16x32xf32>
    %255 = arith.mulf %246, %254 : vector<16x32xf32>
    %256 = arith.truncf %255 : vector<16x32xf32> to vector<16x32xbf16>
    %cst_87 = arith.constant dense<0.000000e+00> : vector<16x16xf32>
    %257 = tpu.matmul %256, %249, %cst_87 {dimension_numbers = #tpu.dot_dimension_numbers<[1], [1], [0], [0], [0, 0, 1, 0], [], []>} : vector<16x32xbf16>, vector<16x32xbf16>, vector<16x16xf32> -> vector<16x16xf32>
    %258 = arith.addf %257, %1 : vector<16x16xf32>
    %cst_88 = arith.constant dense<0xFF800000> : vector<16xf32>
    %259 = vector.multi_reduction <maximumf>, %258, %cst_88 [1] : vector<16x16xf32> to vector<16xf32>
    %260 = vector.shape_cast %259 : vector<16xf32> to vector<16x1xf32>
    %261 = vector.broadcast %260 : vector<16x1xf32> to vector<16x16xf32>
    %262 = arith.subf %258, %261 : vector<16x16xf32>
    %263 = math.exp %262 : vector<16x16xf32>
    %cst_89 = arith.constant dense<0.000000e+00> : vector<16xf32>
    %264 = vector.multi_reduction <add>, %263, %cst_89 [1] : vector<16x16xf32> to vector<16xf32>
    %265 = vector.shape_cast %264 : vector<16xf32> to vector<16x1xf32>
    %266 = tpu.reciprocal %265 {approx = true} : vector<16x1xf32> -> vector<16x1xf32>
    %267 = vector.broadcast %266 : vector<16x1xf32> to vector<16x16xf32>
    %268 = arith.mulf %263, %267 : vector<16x16xf32>
    %269 = vector.shape_cast %252 : vector<32xf32> to vector<1x32xf32>
    %270 = vector.broadcast %269 : vector<1x32xf32> to vector<16x32xf32>
    %271 = arith.mulf %248, %270 : vector<16x32xf32>
    %272 = arith.truncf %271 : vector<16x32xf32> to vector<16x32xbf16>
    %273 = arith.truncf %268 : vector<16x16xf32> to vector<16x16xbf16>
    %cst_90 = arith.constant dense<0.000000e+00> : vector<16x32xf32>
    %274 = tpu.matmul %273, %272, %cst_90 {dimension_numbers = #tpu.dot_dimension_numbers<[1], [0], [0], [1], [0, 0, 1, 1], [], []>} : vector<16x16xbf16>, vector<16x32xbf16>, vector<16x32xf32> -> vector<16x32xf32>
    %275 = arith.addf %250, %274 : vector<16x32xf32>
    %c1_91 = arith.constant 1 : index
    %c0_92 = arith.constant 0 : index
    %276 = vector.load %arg3[%c1_91, %c0_92] : memref<4x32xf32, #tpu.memory_space<vmem>>, vector<1x32xf32>
    %277 = vector.shape_cast %276 : vector<1x32xf32> to vector<32xf32>
    %278 = vector.shape_cast %277 : vector<32xf32> to vector<1x32xf32>
    %279 = vector.broadcast %278 : vector<1x32xf32> to vector<16x32xf32>
    %280 = arith.mulf %246, %279 : vector<16x32xf32>
    %281 = arith.truncf %280 : vector<16x32xf32> to vector<16x32xbf16>
    %cst_93 = arith.constant dense<0.000000e+00> : vector<16x16xf32>
    %282 = tpu.matmul %281, %249, %cst_93 {dimension_numbers = #tpu.dot_dimension_numbers<[1], [1], [0], [0], [0, 0, 1, 0], [], []>} : vector<16x32xbf16>, vector<16x32xbf16>, vector<16x16xf32> -> vector<16x16xf32>
    %283 = arith.addf %282, %1 : vector<16x16xf32>
    %cst_94 = arith.constant dense<0xFF800000> : vector<16xf32>
    %284 = vector.multi_reduction <maximumf>, %283, %cst_94 [1] : vector<16x16xf32> to vector<16xf32>
    %285 = vector.shape_cast %284 : vector<16xf32> to vector<16x1xf32>
    %286 = vector.broadcast %285 : vector<16x1xf32> to vector<16x16xf32>
    %287 = arith.subf %283, %286 : vector<16x16xf32>
    %288 = math.exp %287 : vector<16x16xf32>
    %cst_95 = arith.constant dense<0.000000e+00> : vector<16xf32>
    %289 = vector.multi_reduction <add>, %288, %cst_95 [1] : vector<16x16xf32> to vector<16xf32>
    %290 = vector.shape_cast %289 : vector<16xf32> to vector<16x1xf32>
    %291 = tpu.reciprocal %290 {approx = true} : vector<16x1xf32> -> vector<16x1xf32>
    %292 = vector.broadcast %291 : vector<16x1xf32> to vector<16x16xf32>
    %293 = arith.mulf %288, %292 : vector<16x16xf32>
    %294 = vector.shape_cast %277 : vector<32xf32> to vector<1x32xf32>
    %295 = vector.broadcast %294 : vector<1x32xf32> to vector<16x32xf32>
    %296 = arith.mulf %248, %295 : vector<16x32xf32>
    %297 = arith.truncf %296 : vector<16x32xf32> to vector<16x32xbf16>
    %298 = arith.truncf %293 : vector<16x16xf32> to vector<16x16xbf16>
    %cst_96 = arith.constant dense<0.000000e+00> : vector<16x32xf32>
    %299 = tpu.matmul %298, %297, %cst_96 {dimension_numbers = #tpu.dot_dimension_numbers<[1], [0], [0], [1], [0, 0, 1, 1], [], []>} : vector<16x16xbf16>, vector<16x32xbf16>, vector<16x32xf32> -> vector<16x32xf32>
    %300 = arith.addf %275, %299 : vector<16x32xf32>
    %c2_97 = arith.constant 2 : index
    %c0_98 = arith.constant 0 : index
    %301 = vector.load %arg3[%c2_97, %c0_98] : memref<4x32xf32, #tpu.memory_space<vmem>>, vector<1x32xf32>
    %302 = vector.shape_cast %301 : vector<1x32xf32> to vector<32xf32>
    %303 = vector.shape_cast %302 : vector<32xf32> to vector<1x32xf32>
    %304 = vector.broadcast %303 : vector<1x32xf32> to vector<16x32xf32>
    %305 = arith.mulf %246, %304 : vector<16x32xf32>
    %306 = arith.truncf %305 : vector<16x32xf32> to vector<16x32xbf16>
    %cst_99 = arith.constant dense<0.000000e+00> : vector<16x16xf32>
    %307 = tpu.matmul %306, %249, %cst_99 {dimension_numbers = #tpu.dot_dimension_numbers<[1], [1], [0], [0], [0, 0, 1, 0], [], []>} : vector<16x32xbf16>, vector<16x32xbf16>, vector<16x16xf32> -> vector<16x16xf32>
    %308 = arith.addf %307, %1 : vector<16x16xf32>
    %cst_100 = arith.constant dense<0xFF800000> : vector<16xf32>
    %309 = vector.multi_reduction <maximumf>, %308, %cst_100 [1] : vector<16x16xf32> to vector<16xf32>
    %310 = vector.shape_cast %309 : vector<16xf32> to vector<16x1xf32>
    %311 = vector.broadcast %310 : vector<16x1xf32> to vector<16x16xf32>
    %312 = arith.subf %308, %311 : vector<16x16xf32>
    %313 = math.exp %312 : vector<16x16xf32>
    %cst_101 = arith.constant dense<0.000000e+00> : vector<16xf32>
    %314 = vector.multi_reduction <add>, %313, %cst_101 [1] : vector<16x16xf32> to vector<16xf32>
    %315 = vector.shape_cast %314 : vector<16xf32> to vector<16x1xf32>
    %316 = tpu.reciprocal %315 {approx = true} : vector<16x1xf32> -> vector<16x1xf32>
    %317 = vector.broadcast %316 : vector<16x1xf32> to vector<16x16xf32>
    %318 = arith.mulf %313, %317 : vector<16x16xf32>
    %319 = vector.shape_cast %302 : vector<32xf32> to vector<1x32xf32>
    %320 = vector.broadcast %319 : vector<1x32xf32> to vector<16x32xf32>
    %321 = arith.mulf %248, %320 : vector<16x32xf32>
    %322 = arith.truncf %321 : vector<16x32xf32> to vector<16x32xbf16>
    %323 = arith.truncf %318 : vector<16x16xf32> to vector<16x16xbf16>
    %cst_102 = arith.constant dense<0.000000e+00> : vector<16x32xf32>
    %324 = tpu.matmul %323, %322, %cst_102 {dimension_numbers = #tpu.dot_dimension_numbers<[1], [0], [0], [1], [0, 0, 1, 1], [], []>} : vector<16x16xbf16>, vector<16x32xbf16>, vector<16x32xf32> -> vector<16x32xf32>
    %325 = arith.addf %300, %324 : vector<16x32xf32>
    %c3_103 = arith.constant 3 : index
    %c0_104 = arith.constant 0 : index
    %326 = vector.load %arg3[%c3_103, %c0_104] : memref<4x32xf32, #tpu.memory_space<vmem>>, vector<1x32xf32>
    %327 = vector.shape_cast %326 : vector<1x32xf32> to vector<32xf32>
    %328 = vector.shape_cast %327 : vector<32xf32> to vector<1x32xf32>
    %329 = vector.broadcast %328 : vector<1x32xf32> to vector<16x32xf32>
    %330 = arith.mulf %246, %329 : vector<16x32xf32>
    %331 = arith.truncf %330 : vector<16x32xf32> to vector<16x32xbf16>
    %cst_105 = arith.constant dense<0.000000e+00> : vector<16x16xf32>
    %332 = tpu.matmul %331, %249, %cst_105 {dimension_numbers = #tpu.dot_dimension_numbers<[1], [1], [0], [0], [0, 0, 1, 0], [], []>} : vector<16x32xbf16>, vector<16x32xbf16>, vector<16x16xf32> -> vector<16x16xf32>
    %333 = arith.addf %332, %1 : vector<16x16xf32>
    %cst_106 = arith.constant dense<0xFF800000> : vector<16xf32>
    %334 = vector.multi_reduction <maximumf>, %333, %cst_106 [1] : vector<16x16xf32> to vector<16xf32>
    %335 = vector.shape_cast %334 : vector<16xf32> to vector<16x1xf32>
    %336 = vector.broadcast %335 : vector<16x1xf32> to vector<16x16xf32>
    %337 = arith.subf %333, %336 : vector<16x16xf32>
    %338 = math.exp %337 : vector<16x16xf32>
    %cst_107 = arith.constant dense<0.000000e+00> : vector<16xf32>
    %339 = vector.multi_reduction <add>, %338, %cst_107 [1] : vector<16x16xf32> to vector<16xf32>
    %340 = vector.shape_cast %339 : vector<16xf32> to vector<16x1xf32>
    %341 = tpu.reciprocal %340 {approx = true} : vector<16x1xf32> -> vector<16x1xf32>
    %342 = vector.broadcast %341 : vector<16x1xf32> to vector<16x16xf32>
    %343 = arith.mulf %338, %342 : vector<16x16xf32>
    %344 = vector.shape_cast %327 : vector<32xf32> to vector<1x32xf32>
    %345 = vector.broadcast %344 : vector<1x32xf32> to vector<16x32xf32>
    %346 = arith.mulf %248, %345 : vector<16x32xf32>
    %347 = arith.truncf %346 : vector<16x32xf32> to vector<16x32xbf16>
    %348 = arith.truncf %343 : vector<16x16xf32> to vector<16x16xbf16>
    %cst_108 = arith.constant dense<0.000000e+00> : vector<16x32xf32>
    %349 = tpu.matmul %348, %347, %cst_108 {dimension_numbers = #tpu.dot_dimension_numbers<[1], [0], [0], [1], [0, 0, 1, 1], [], []>} : vector<16x16xbf16>, vector<16x32xbf16>, vector<16x32xf32> -> vector<16x32xf32>
    %350 = arith.addf %325, %349 : vector<16x32xf32>
    %351 = arith.truncf %350 : vector<16x32xf32> to vector<16x32xbf16>
    %c1_109 = arith.constant 1 : index
    %c0_110 = arith.constant 0 : index
    %c0_111 = arith.constant 0 : index
    %352 = vector.load %arg8[%c1_109, %c0_110, %c0_111] : memref<2x32x32xbf16, #tpu.memory_space<vmem>>, vector<1x32x32xbf16>
    %353 = vector.shape_cast %352 : vector<1x32x32xbf16> to vector<32x32xbf16>
    %cst_112 = arith.constant dense<0.000000e+00> : vector<16x32xf32>
    %354 = tpu.matmul %351, %353, %cst_112 {dimension_numbers = #tpu.dot_dimension_numbers<[1], [0], [0], [1], [0, 0, 1, 1], [], []>} : vector<16x32xbf16>, vector<32x32xbf16>, vector<16x32xf32> -> vector<16x32xf32>
    %c1_113 = arith.constant 1 : index
    %c0_114 = arith.constant 0 : index
    %355 = vector.load %arg9[%c1_113, %c0_114] : memref<2x32xf32, #tpu.memory_space<vmem>>, vector<1x32xf32>
    %356 = vector.shape_cast %355 : vector<1x32xf32> to vector<32xf32>
    %357 = vector.shape_cast %356 : vector<32xf32> to vector<1x32xf32>
    %358 = vector.broadcast %357 : vector<1x32xf32> to vector<16x32xf32>
    %359 = arith.addf %354, %358 : vector<16x32xf32>
    %360 = arith.addf %208, %359 : vector<16x32xf32>
    %c1_115 = arith.constant 1 : index
    %c0_116 = arith.constant 0 : index
    %361 = vector.load %arg10[%c1_115, %c0_116] : memref<2x32xf32, #tpu.memory_space<vmem>>, vector<1x32xf32>
    %362 = vector.shape_cast %361 : vector<1x32xf32> to vector<32xf32>
    %c1_117 = arith.constant 1 : index
    %c0_118 = arith.constant 0 : index
    %363 = vector.load %arg11[%c1_117, %c0_118] : memref<2x32xf32, #tpu.memory_space<vmem>>, vector<1x32xf32>
    %364 = vector.shape_cast %363 : vector<1x32xf32> to vector<32xf32>
    %cst_119 = arith.constant dense<0.000000e+00> : vector<16xf32>
    %365 = vector.multi_reduction <add>, %360, %cst_119 [1] : vector<16x32xf32> to vector<16xf32>
    %366 = vector.shape_cast %365 : vector<16xf32> to vector<16x1xf32>
    %cst_120 = arith.constant 3.200000e+01 : f32
    %367 = vector.broadcast %cst_120 : f32 to vector<16x1xf32>
    %368 = arith.divf %366, %367 : vector<16x1xf32>
    %369 = arith.mulf %360, %360 : vector<16x32xf32>
    %cst_121 = arith.constant dense<0.000000e+00> : vector<16xf32>
    %370 = vector.multi_reduction <add>, %369, %cst_121 [1] : vector<16x32xf32> to vector<16xf32>
    %371 = vector.shape_cast %370 : vector<16xf32> to vector<16x1xf32>
    %cst_122 = arith.constant 3.200000e+01 : f32
    %372 = vector.broadcast %cst_122 : f32 to vector<16x1xf32>
    %373 = arith.divf %371, %372 : vector<16x1xf32>
    %374 = arith.mulf %368, %368 : vector<16x1xf32>
    %375 = arith.subf %373, %374 : vector<16x1xf32>
    %376 = vector.broadcast %368 : vector<16x1xf32> to vector<16x32xf32>
    %377 = arith.subf %360, %376 : vector<16x32xf32>
    %cst_123 = arith.constant 9.99999974E-6 : f32
    %378 = vector.broadcast %cst_123 : f32 to vector<16x1xf32>
    %379 = arith.addf %375, %378 : vector<16x1xf32>
    %380 = math.rsqrt %379 : vector<16x1xf32>
    %381 = vector.broadcast %380 : vector<16x1xf32> to vector<16x32xf32>
    %382 = arith.mulf %377, %381 : vector<16x32xf32>
    %383 = vector.shape_cast %362 : vector<32xf32> to vector<1x32xf32>
    %384 = vector.broadcast %383 : vector<1x32xf32> to vector<16x32xf32>
    %385 = arith.mulf %382, %384 : vector<16x32xf32>
    %386 = vector.shape_cast %364 : vector<32xf32> to vector<1x32xf32>
    %387 = vector.broadcast %386 : vector<1x32xf32> to vector<16x32xf32>
    %388 = arith.addf %385, %387 : vector<16x32xf32>
    %389 = arith.truncf %388 : vector<16x32xf32> to vector<16x32xbf16>
    %c1_124 = arith.constant 1 : index
    %c0_125 = arith.constant 0 : index
    %c0_126 = arith.constant 0 : index
    %390 = vector.load %arg12[%c1_124, %c0_125, %c0_126] : memref<2x32x128xbf16, #tpu.memory_space<vmem>>, vector<1x32x128xbf16>
    %391 = vector.shape_cast %390 : vector<1x32x128xbf16> to vector<32x128xbf16>
    %cst_127 = arith.constant dense<0.000000e+00> : vector<16x128xf32>
    %392 = tpu.matmul %389, %391, %cst_127 {dimension_numbers = #tpu.dot_dimension_numbers<[1], [0], [0], [1], [0, 0, 1, 1], [], []>} : vector<16x32xbf16>, vector<32x128xbf16>, vector<16x128xf32> -> vector<16x128xf32>
    %c1_128 = arith.constant 1 : index
    %c0_129 = arith.constant 0 : index
    %393 = vector.load %arg13[%c1_128, %c0_129] : memref<2x128xf32, #tpu.memory_space<vmem>>, vector<1x128xf32>
    %394 = vector.shape_cast %393 : vector<1x128xf32> to vector<128xf32>
    %395 = vector.shape_cast %394 : vector<128xf32> to vector<1x128xf32>
    %396 = vector.broadcast %395 : vector<1x128xf32> to vector<16x128xf32>
    %397 = arith.addf %392, %396 : vector<16x128xf32>
    %cst_130 = arith.constant 5.000000e-01 : f32
    %398 = vector.broadcast %cst_130 : f32 to vector<16x128xf32>
    %399 = arith.mulf %398, %397 : vector<16x128xf32>
    %cst_131 = arith.constant 0.707106769 : f32
    %400 = vector.broadcast %cst_131 : f32 to vector<16x128xf32>
    %401 = arith.mulf %397, %400 : vector<16x128xf32>
    %402 = math.erf %401 : vector<16x128xf32>
    %cst_132 = arith.constant 1.000000e+00 : f32
    %403 = vector.broadcast %cst_132 : f32 to vector<16x128xf32>
    %404 = arith.addf %403, %402 : vector<16x128xf32>
    %405 = arith.mulf %399, %404 : vector<16x128xf32>
    %406 = arith.truncf %405 : vector<16x128xf32> to vector<16x128xbf16>
    %c1_133 = arith.constant 1 : index
    %c0_134 = arith.constant 0 : index
    %c0_135 = arith.constant 0 : index
    %407 = vector.load %arg14[%c1_133, %c0_134, %c0_135] : memref<2x128x32xbf16, #tpu.memory_space<vmem>>, vector<1x128x32xbf16>
    %408 = vector.shape_cast %407 : vector<1x128x32xbf16> to vector<128x32xbf16>
    %cst_136 = arith.constant dense<0.000000e+00> : vector<16x32xf32>
    %409 = tpu.matmul %406, %408, %cst_136 {dimension_numbers = #tpu.dot_dimension_numbers<[1], [0], [0], [1], [0, 0, 1, 1], [], []>} : vector<16x128xbf16>, vector<128x32xbf16>, vector<16x32xf32> -> vector<16x32xf32>
    %c1_137 = arith.constant 1 : index
    %c0_138 = arith.constant 0 : index
    %410 = vector.load %arg15[%c1_137, %c0_138] : memref<2x32xf32, #tpu.memory_space<vmem>>, vector<1x32xf32>
    %411 = vector.shape_cast %410 : vector<1x32xf32> to vector<32xf32>
    %412 = vector.shape_cast %411 : vector<32xf32> to vector<1x32xf32>
    %413 = vector.broadcast %412 : vector<1x32xf32> to vector<16x32xf32>
    %414 = arith.addf %409, %413 : vector<16x32xf32>
    %415 = arith.addf %360, %414 : vector<16x32xf32>
    %c0_139 = arith.constant 0 : index
    %c0_140 = arith.constant 0 : index
    %416 = vector.load %arg16[%c0_139, %c0_140] : memref<1x32xf32, #tpu.memory_space<vmem>>, vector<1x32xf32>
    %417 = vector.shape_cast %416 : vector<1x32xf32> to vector<32xf32>
    %c0_141 = arith.constant 0 : index
    %c0_142 = arith.constant 0 : index
    %418 = vector.load %arg17[%c0_141, %c0_142] : memref<1x32xf32, #tpu.memory_space<vmem>>, vector<1x32xf32>
    %419 = vector.shape_cast %418 : vector<1x32xf32> to vector<32xf32>
    %cst_143 = arith.constant dense<0.000000e+00> : vector<16xf32>
    %420 = vector.multi_reduction <add>, %415, %cst_143 [1] : vector<16x32xf32> to vector<16xf32>
    %421 = vector.shape_cast %420 : vector<16xf32> to vector<16x1xf32>
    %cst_144 = arith.constant 3.200000e+01 : f32
    %422 = vector.broadcast %cst_144 : f32 to vector<16x1xf32>
    %423 = arith.divf %421, %422 : vector<16x1xf32>
    %424 = arith.mulf %415, %415 : vector<16x32xf32>
    %cst_145 = arith.constant dense<0.000000e+00> : vector<16xf32>
    %425 = vector.multi_reduction <add>, %424, %cst_145 [1] : vector<16x32xf32> to vector<16xf32>
    %426 = vector.shape_cast %425 : vector<16xf32> to vector<16x1xf32>
    %cst_146 = arith.constant 3.200000e+01 : f32
    %427 = vector.broadcast %cst_146 : f32 to vector<16x1xf32>
    %428 = arith.divf %426, %427 : vector<16x1xf32>
    %429 = arith.mulf %423, %423 : vector<16x1xf32>
    %430 = arith.subf %428, %429 : vector<16x1xf32>
    %431 = vector.broadcast %423 : vector<16x1xf32> to vector<16x32xf32>
    %432 = arith.subf %415, %431 : vector<16x32xf32>
    %cst_147 = arith.constant 9.99999974E-6 : f32
    %433 = vector.broadcast %cst_147 : f32 to vector<16x1xf32>
    %434 = arith.addf %430, %433 : vector<16x1xf32>
    %435 = math.rsqrt %434 : vector<16x1xf32>
    %436 = vector.broadcast %435 : vector<16x1xf32> to vector<16x32xf32>
    %437 = arith.mulf %432, %436 : vector<16x32xf32>
    %438 = vector.shape_cast %417 : vector<32xf32> to vector<1x32xf32>
    %439 = vector.broadcast %438 : vector<1x32xf32> to vector<16x32xf32>
    %440 = arith.mulf %437, %439 : vector<16x32xf32>
    %441 = vector.shape_cast %419 : vector<32xf32> to vector<1x32xf32>
    %442 = vector.broadcast %441 : vector<1x32xf32> to vector<16x32xf32>
    %443 = arith.addf %440, %442 : vector<16x32xf32>
    %444 = arith.truncf %443 : vector<16x32xf32> to vector<16x32xbf16>
    %c0_148 = arith.constant 0 : index
    %c0_149 = arith.constant 0 : index
    %445 = vector.load %arg18[%c0_148, %c0_149] : memref<32x128xbf16, #tpu.memory_space<vmem>>, vector<32x128xbf16>
    %cst_150 = arith.constant dense<0.000000e+00> : vector<16x128xf32>
    %446 = tpu.matmul %444, %445, %cst_150 {dimension_numbers = #tpu.dot_dimension_numbers<[1], [0], [0], [1], [0, 0, 1, 1], [], []>} : vector<16x32xbf16>, vector<32x128xbf16>, vector<16x128xf32> -> vector<16x128xf32>
    %c0_151 = arith.constant 0 : index
    %c0_152 = arith.constant 0 : index
    %447 = vector.load %arg19[%c0_151, %c0_152] : memref<16x128xf32, #tpu.memory_space<vmem>>, vector<16x128xf32>
    tpu.vector_store %arg19[%c0_151, %c0_152], %446 {strides = array<i32>} : memref<16x128xf32, #tpu.memory_space<vmem>>, vector<16x128xf32>,
    %448 = tpu.concatenate %181, %207, %388, %414 in 1 : vector<16x32xf32>, vector<16x32xf32>, vector<16x32xf32>, vector<16x32xf32> -> vector<16x128xf32>
    %c0_153 = arith.constant 0 : index
    %c0_154 = arith.constant 0 : index
    %449 = vector.load %arg20[%c0_153, %c0_154] : memref<16x128xf32, #tpu.memory_space<vmem>>, vector<16x128xf32>
    tpu.vector_store %arg20[%c0_153, %c0_154], %448 {strides = array<i32>} : memref<16x128xf32, #tpu.memory_space<vmem>>, vector<16x128xf32>,
    return
  }
  func.func @transform_0(%arg0: i32) -> (i32, i32) {
    %c0_i32 = arith.constant 0 : i32
    %c0_i32_0 = arith.constant 0 : i32
    %c0_i32_1 = arith.constant 0 : i32
    return %c0_i32, %c0_i32_0 : i32, i32
  }
  func.func @transform_1(%arg0: i32) -> (i32, i32) {
    %c0_i32 = arith.constant 0 : i32
    %c0_i32_0 = arith.constant 0 : i32
    %c0_i32_1 = arith.constant 0 : i32
    return %c0_i32, %c0_i32_0 : i32, i32
  }
  func.func @transform_2(%arg0: i32) -> (i32, i32) {
    %c0_i32 = arith.constant 0 : i32
    %c0_i32_0 = arith.constant 0 : i32
    %c0_i32_1 = arith.constant 0 : i32
    return %c0_i32, %c0_i32_0 : i32, i32
  }
  func.func @transform_3(%arg0: i32) -> (i32, i32) {
    %c0_i32 = arith.constant 0 : i32
    %c0_i32_0 = arith.constant 0 : i32
    %c0_i32_1 = arith.constant 0 : i32
    return %c0_i32, %c0_i32_0 : i32, i32
  }
  func.func @transform_4(%arg0: i32) -> (i32, i32) {
    %c0_i32 = arith.constant 0 : i32
    %c0_i32_0 = arith.constant 0 : i32
    %c0_i32_1 = arith.constant 0 : i32
    return %c0_i32, %c0_i32_0 : i32, i32
  }
  func.func @transform_5(%arg0: i32) -> (i32, i32, i32) {
    %c0_i32 = arith.constant 0 : i32
    %c0_i32_0 = arith.constant 0 : i32
    %c0_i32_1 = arith.constant 0 : i32
    %c0_i32_2 = arith.constant 0 : i32
    return %c0_i32, %c0_i32_0, %c0_i32_1 : i32, i32, i32
  }
  func.func @transform_6(%arg0: i32) -> (i32, i32) {
    %c0_i32 = arith.constant 0 : i32
    %c0_i32_0 = arith.constant 0 : i32
    %c0_i32_1 = arith.constant 0 : i32
    return %c0_i32, %c0_i32_0 : i32, i32
  }
  func.func @transform_7(%arg0: i32) -> (i32, i32, i32) {
    %c0_i32 = arith.constant 0 : i32
    %c0_i32_0 = arith.constant 0 : i32
    %c0_i32_1 = arith.constant 0 : i32
    %c0_i32_2 = arith.constant 0 : i32
    return %c0_i32, %c0_i32_0, %c0_i32_1 : i32, i32, i32
  }
  func.func @transform_8(%arg0: i32) -> (i32, i32) {
    %c0_i32 = arith.constant 0 : i32
    %c0_i32_0 = arith.constant 0 : i32
    %c0_i32_1 = arith.constant 0 : i32
    return %c0_i32, %c0_i32_0 : i32, i32
  }
  func.func @transform_9(%arg0: i32) -> (i32, i32) {
    %c0_i32 = arith.constant 0 : i32
    %c0_i32_0 = arith.constant 0 : i32
    %c0_i32_1 = arith.constant 0 : i32
    return %c0_i32, %c0_i32_0 : i32, i32
  }
  func.func @transform_10(%arg0: i32) -> (i32, i32) {
    %c0_i32 = arith.constant 0 : i32
    %c0_i32_0 = arith.constant 0 : i32
    %c0_i32_1 = arith.constant 0 : i32
    return %c0_i32, %c0_i32_0 : i32, i32
  }
  func.func @transform_11(%arg0: i32) -> (i32, i32, i32) {
    %c0_i32 = arith.constant 0 : i32
    %c0_i32_0 = arith.constant 0 : i32
    %c0_i32_1 = arith.constant 0 : i32
    %c0_i32_2 = arith.constant 0 : i32
    return %c0_i32, %c0_i32_0, %c0_i32_1 : i32, i32, i32
  }
  func.func @transform_12(%arg0: i32) -> (i32, i32) {
    %c0_i32 = arith.constant 0 : i32
    %c0_i32_0 = arith.constant 0 : i32
    %c0_i32_1 = arith.constant 0 : i32
    return %c0_i32, %c0_i32_0 : i32, i32
  }
  func.func @transform_13(%arg0: i32) -> (i32, i32, i32) {
    %c0_i32 = arith.constant 0 : i32
    %c0_i32_0 = arith.constant 0 : i32
    %c0_i32_1 = arith.constant 0 : i32
    %c0_i32_2 = arith.constant 0 : i32
    return %c0_i32, %c0_i32_0, %c0_i32_1 : i32, i32, i32
  }
  func.func @transform_14(%arg0: i32) -> (i32, i32) {
    %c0_i32 = arith.constant 0 : i32
    %c0_i32_0 = arith.constant 0 : i32
    %c0_i32_1 = arith.constant 0 : i32
    return %c0_i32, %c0_i32_0 : i32, i32
  }
  func.func @transform_15(%arg0: i32) -> (i32, i32) {
    %c0_i32 = arith.constant 0 : i32
    %c0_i32_0 = arith.constant 0 : i32
    %c0_i32_1 = arith.constant 0 : i32
    return %c0_i32, %c0_i32_0 : i32, i32
  }
  func.func @transform_16(%arg0: i32) -> (i32, i32) {
    %c0_i32 = arith.constant 0 : i32
    %c0_i32_0 = arith.constant 0 : i32
    %c0_i32_1 = arith.constant 0 : i32
    return %c0_i32, %c0_i32_0 : i32, i32
  }
  func.func @transform_17(%arg0: i32) -> (i32, i32) {
    %c0_i32 = arith.constant 0 : i32
    %c0_i32_0 = arith.constant 0 : i32
    %c0_i32_1 = arith.constant 0 : i32
    return %c0_i32, %c0_i32_0 : i32, i32
  }
  func.func @transform_18(%arg0: i32) -> (i32, i32) {
    %c0_i32 = arith.constant 0 : i32
    %c0_i32_0 = arith.constant 0 : i32
    %c0_i32_1 = arith.constant 0 : i32
    return %c0_i32, %c0_i32_0 : i32, i32
  }
  func.func @transform_19(%arg0: i32) -> (i32, i32) {
    %c0_i32 = arith.constant 0 : i32
    %c0_i32_0 = arith.constant 0 : i32
    %c0_i32_1 = arith.constant 0 : i32
    return %c0_i32, %c0_i32_0 : i32, i32
  }
}

</mosaic_0001>

<bundles_post_ra>
// kernel: gpt_forward.1
= control target key start
LH: loop header
LB: loop body
LE: loop exit
PB: predicated region body
PF: predicated region fallthrough
CT: control target
= control target key end

     0   :  { %s3380_s0 = inlined_call_operand.vmem [shape: f32[16,32], index: 0, kind: input, shape index: {}]   ;;  %s3381_s1 = inlined_call_operand.vmem [shape: f32[16,16], index: 1, kind: input, shape index: {}]   ;;  %s3382_s2 = inlined_call_operand.vmem [shape: f32[4,32], index: 2, kind: input, shape index: {}]   ;;  %s3383_s3 = inlined_call_operand.vmem [shape: f32[2,32], index: 3, kind: input, shape index: {}]   ;;  %s3384_s4 = inlined_call_operand.vmem [shape: f32[2,32], index: 4, kind: input, shape index: {}]   ;;  %s3385_s5 = inlined_call_operand.vmem [shape: bf16[2,32,96], index: 5, kind: input, shape index: {}]   ;;  %s3386_s6 = inlined_call_operand.vmem [shape: f32[2,96], index: 6, kind: input, shape index: {}]   ;;  %s3387_s7 = inlined_call_operand.vmem [shape: bf16[2,32,32], index: 7, kind: input, shape index: {}]   ;;  %s3388_s8 = inlined_call_operand.vmem [shape: f32[2,32], index: 8, kind: input, shape index: {}]   ;;  %s3389_s9 = inlined_call_operand.vmem [shape: f32[2,32], index: 9, kind: input, shape index: {}]   ;;  %s3390_s10 = inlined_call_operand.vmem [shape: f32[2,32], index: 10, kind: input, shape index: {}]   ;;  %s3391_s11 = inlined_call_operand.vmem [shape: bf16[2,32,128], index: 11, kind: input, shape index: {}]   ;;  %s3392_s12 = inlined_call_operand.vmem [shape: f32[2,128], index: 12, kind: input, shape index: {}]   ;;  %s3393_s13 = inlined_call_operand.vmem [shape: bf16[2,128,32], index: 13, kind: input, shape index: {}]   ;;  %s3394_s14 = inlined_call_operand.vmem [shape: f32[2,32], index: 14, kind: input, shape index: {}]   ;;  %s3395_s15 = inlined_call_operand.vmem [shape: f32[1,32], index: 15, kind: input, shape index: {}]   ;;  %s3396_s16 = inlined_call_operand.vmem [shape: f32[1,32], index: 16, kind: input, shape index: {}]   ;;  %s3397_s17 = inlined_call_operand.vmem [shape: bf16[32,128], index: 17, kind: input, shape index: {}]   ;;  %s3398_s18 = inlined_call_operand.hbm [shape: f32[16,128], index: 18, kind: output, shape index: {0}]   ;;  %s3399_s19 = inlined_call_operand.vmem [shape: f32[16,128], index: 19, kind: output, shape index: {1}]  }
   0x1   :  { %3404 = sst [smem:[#allocation5_spill]] %s3380_s0 }
   0x2   :  { %3405 = sst [smem:[#allocation6_spill]] %s3381_s1 }
   0x3   :  { %3406 = sst [smem:[#allocation7_spill]] %s3382_s2 }
   0x4   :  { %3407 = sst [smem:[#allocation8_spill]] %s3383_s3 }
   0x5   :  { %s3408_s20 = sld [smem:[#allocation5_spill]]  ;;  %vm69_vm0 = vcmask 261120  }
   0xb   :  { %v2742_v0 = vld [vmem:[%s3408_s20] sm:$0xff]  ;;  %v2747_v1 = vld [vmem:[%s3408_s20 + $0x8] sm:$0xff] }
   0xc   :  { %v70_v2 = vsel %vm69_vm0, %v2742_v0, 0.0  ;;  %v79_v3 = vmul.f32 %v2742_v0, %v2742_v0  ;;  %v73_v4 = vsel %vm69_vm0, %v2747_v1, 0.0  ;;  %v80_v5 = vmul.f32 %v2747_v1, %v2747_v1 }
   0xd   :  { %71 = vadd.xlane.f32.xlu0 %v70_v2 }
   0xe   :  { %v81_v6 = vsel %vm69_vm0, %v79_v3, 0.0  ;;  %v84_v7 = vsel %vm69_vm0, %v80_v5, 0.0 }
   0xf   :  { %82 = vadd.xlane.f32.xlu1 %v81_v6 }
  0x11   :  { %74 = vadd.xlane.f32.xlu0 %v73_v4 }
  0x13   :  { %85 = vadd.xlane.f32.xlu1 %v84_v7 }
  0x14   :  { %25 = vsyncpa [#allocation3], 0  ;;  %v2485_v8 = vld [vmem:[%s3385_s5] sm:$0xff]   ;;  %v2631_v9 = vmov 0.0   ;;  %vm2632_vm1 = vmmov 0   ;;  %v2486_v10 = vld [vmem:[%s3385_s5 + $0x8] sm:$0xff]  }
  0x15   :  { %2261 = vmatprep.subr.bf16.mxu1 %v2631_v9  ;;  %2265 = vmatprep.mubr.msk.bf16.mxu1 %vm2632_vm1, %v2631_v9  ;;  %s3409_s26 = sld [smem:[#allocation7_spill]]  ;;  %s2633_s27 = smov 64   ;;  %v2088_v35 = vld [vmem:[%s3384_s4] ss:$0 sm:$0xff]  ;;  %vm238_vm2 = vcmask 130048   ;;  %vm2059_vm3 = vcmask 523264  }
  0x16   :  { %2262 = vmatpush3.bf16.msra.mxu1 %v2485_v8  ;;  %2275 = vmatprep.subr.bf16.mxu0 %v2631_v9  ;;  %s3410_s20 = sld [smem:[#allocation8_spill]]  ;;  %v2089_v40 = vld [vmem:[%s3386_s6] ss:$0 sm:$0xff]  ;;  %s2634_s23 = smov 96   ;;  %vm2062_vm4 = vcmask 785408  }
  0x17   :  { %2263 = vmatprep.subr.bf16.mxu1 %v2631_v9  ;;  %2277 = vmatprep.mubr.msk.bf16.mxu0 %vm2632_vm1, %v2631_v9  ;;  %s3411_s30 = sld [smem:[#allocation6_spill]] }
  0x1a   :  { %2264 = vmatpush3.bf16.msra.mxu1 %v2486_v10 }
  0x1b   :  { %2269 = vmatprep.subr.bf16.mxu1 %v2631_v9  ;;  %v2776_v11 = vld [vmem:[%s3409_s26 + $0x1] ss:$0 sm:$0xff]  ;;  %v2783_v12 = vld [vmem:[%s3409_s26] ss:$0 sm:$0xff]  ;;  %v2826_v56 = vld [vmem:[%s3409_s26 + $0x2] ss:$0 sm:$0xff] }
  0x1c   :  { %v2087_v30 = vld [vmem:[%s3410_s20] ss:$0 sm:$0xff]  ;;  %v2841_v60 = vld [vmem:[%s3409_s26 + $0x3] ss:$0 sm:$0xff] }
  0x1d   :  { %v2854_v2 = vld [vmem:[%s3411_s30] sm:$0xff] }
  0x24   :  { %344 = vrot.lane.b32.xlu1 %v2776_v11, %s2633_s27 }
  0x28   :  { %262 = vrot.lane.b32.xlu1 %v2783_v12, %s2633_s27 }
  0x9a   :  { %v72_v13 = vpop.xlane.xlu0 %71 }
  0x9b   :  { %v77_v14 = vmul.f32 0.03125, %v72_v13 }
  0x9c   :  { %v83_v15 = vpop.xlane.xlu1 %82 }
  0x9d   :  { %v89_v16 = vmul.f32 %v77_v14, %v77_v14  ;;  %v87_v17 = vmul.f32 0.03125, %v83_v15  ;;  %v93_v27 = vsub.f32 %v2742_v0, %v77_v14 }
  0x9e   :  { %v75_v18 = vpop.xlane.xlu0 %74 }
  0x9f   :  { %v91_v19 = vsub.f32 %v87_v17, %v89_v16  ;;  %v78_v20 = vmul.f32 0.03125, %v75_v18  ;;  %v2862_v17 = vld [vmem:[%s3411_s30 + $0x8] sm:$0xff] }
  0xa0   :  { %v86_v21 = vpop.xlane.xlu1 %85 }
  0xa1   :  { %v95_v22 = vadd.f32 1e-05, %v91_v19  ;;  %v90_v23 = vmul.f32 %v78_v20, %v78_v20  ;;  %v88_v24 = vmul.f32 0.03125, %v86_v21  ;;  %v94_v31 = vsub.f32 %v2747_v1, %v78_v20 }
  0xa3   :  { %2515 = vrsqrt.f32 %v95_v22  ;;  %v92_v25 = vsub.f32 %v88_v24, %v90_v23 }
  0xa5   :  { %v96_v26 = vadd.f32 1e-05, %v92_v25 }
  0xa7   :  { %2517 = vrsqrt.f32 %v96_v26 }
  0xad   :  { %v2516_v28 = vpop.eup %2515 }
  0xae   :  { %v99_v29 = vmul.f32 %v2516_v28, %v93_v27 }
  0xb0   :  { %v105_v34 = vmul.f32 %v2087_v30, %v99_v29 }
  0xb1   :  { %v2518_v32 = vpop.eup %2517 }
  0xb2   :  { %v100_v33 = vmul.f32 %v2518_v32, %v94_v31  ;;  %v111_v37 = vadd.f32 %v2088_v35, %v105_v34 }
  0xb4   :  { %v106_v36 = vmul.f32 %v2087_v30, %v100_v33 }
  0xb6   :  { %v112_v38 = vadd.f32 %v2088_v35, %v106_v36 }
  0xb8   :  { %v113_v39 = vpack.c.bf16 %v112_v38, %v111_v37 }
  0xba   :  { %2266 = vmatmul.mubr.msk.bf16.vlgmr.msra.gmra.mrb[0].mxu1 %vm69_vm0, %v113_v39  ;;  %v2890_v39 = vpop.permute.xlu1 %344 }
  0xbb   :  { %2271 = vmatprep.mubr.msk.bf16.mxu1 %vm2632_vm1, %v2631_v9 }
 0x18d   :  { %v172_v41 = vpop.f32.mrb[0].mxu1 }
 0x18e   :  { %v2267_v42 = vpop.f32.mrb[1].mxu1  ;;  %v2801_v44 = vadd.f32 %v2089_v40, %v172_v41 }
 0x18f   :  { %v175_v43 = vpop.f32.mrb[2].mxu1 }
 0x190   :  { %v2803_v45 = vadd.f32 %v2089_v40, %v175_v43  ;;  %v2268_v46 = vpop.f32.mrb[3].mxu1  ;;  %v185_v52 = vmul.f32 %v2783_v12, %v2801_v44  ;;  %v274_v53 = vmul.f32 %v2776_v11, %v2801_v44  ;;  %v452_v58 = vmul.f32 %v2826_v56, %v2801_v44  ;;  %v2892_v40 = vpop.permute.xlu1 %262 }
 0x191   :  { %v584_v62 = vmul.f32 %v2841_v60, %v2801_v44 }
 0x192   :  { %v179_v47 = vpack.c.bf16 %v2803_v45, %v2801_v44  ;;  %v186_v50 = vmul.f32 %v2783_v12, %v2803_v45  ;;  %v275_v51 = vmul.f32 %v2776_v11, %v2803_v45  ;;  %v453_v57 = vmul.f32 %v2826_v56, %v2803_v45 }
 0x193   :  { %v585_v61 = vmul.f32 %v2841_v60, %v2803_v45 }
 0x194   :  { %189 = vrot.lane.b32.xlu0 %v179_v47, %s2634_s23  ;;  %v187_v54 = vpack.c.bf16 %v186_v50, %v185_v52  ;;  %v276_v55 = vpack.c.bf16 %v275_v51, %v274_v53  ;;  %v454_v59 = vpack.c.bf16 %v453_v57, %v452_v58 }
 0x195   :  { %v586_v63 = vpack.c.bf16 %v585_v61, %v584_v62 }
 0x206   :  { %v190_v48 = vpop.permute.xlu0 %189 }
 0x207   :  { %v195_v49 = vsel %vm69_vm0, %v190_v48, 0 }
 0x208   :  { %2270 = vmatpush3.bf16.xpose.msra.mxu1 %v195_v49  ;;  %2276 = vmatpush3.bf16.xpose.msra.mxu0 %v195_v49 }
 0x209   :  { %2293 = vmatprep.subr.bf16.mxu0 %v2631_v9  ;;  %2281 = vmatprep.subr.bf16.mxu1 %v2631_v9 }
 0x20f   :  { %2272 = vmatmul.mubr.msk.bf16.vlgmr.msra.gmra.mrb[4].mxu1 %vm69_vm0, %v187_v54  ;;  %2278 = vmatmul.mubr.msk.bf16.vlgmr.msra.gmra.mrb[0].mxu0 %vm69_vm0, %v276_v55 }
 0x210   :  { %2294 = vmatpush3.bf16.xpose.msra.mxu0 %v195_v49  ;;  %2295 = vmatprep.mubr.msk.bf16.mxu0 %vm2632_vm1, %v2631_v9 }
 0x211   :  { %2305 = vmatprep.subr.bf16.mxu0 %v2631_v9  ;;  %2283 = vmatprep.mubr.msk.bf16.mxu1 %vm2632_vm1, %v2631_v9 }
 0x217   :  { %2296 = vmatmul.mubr.msk.bf16.vlgmr.msra.gmra.mrb[4].mxu0 %vm69_vm0, %v454_v59 }
 0x218   :  { %2306 = vmatpush3.bf16.xpose.msra.mxu0 %v195_v49  ;;  %2307 = vmatprep.mubr.msk.bf16.mxu0 %vm2632_vm1, %v2631_v9 }
 0x219   :  { %2317 = vmatprep.subr.bf16.mxu0 %v2631_v9 }
 0x21f   :  { %2308 = vmatmul.mubr.msk.bf16.vlgmr.msra.gmra.mrb[8].mxu0 %vm69_vm0, %v586_v63 }
 0x220   :  { %2321 = vmatprep.mubr.msk.bf16.mxu0 %vm2632_vm1, %v2631_v9 }
 0x2e2   :  { %v231_v3 = vpop.f32.mrb[4].mxu1  ;;  %v314_v4 = vpop.f32.mrb[0].mxu0 }
 0x2e3   :  { %v315_v5 = vadd.f32 %v314_v4, %v2854_v2  ;;  %v2273_v6 = vpop.f32.mrb[5].mxu1  ;;  %v2279_v7 = vpop.f32.mrb[1].mxu0  ;;  %v232_v13 = vadd.f32 %v231_v3, %v2854_v2 }
 0x2e4   :  { %v234_v8 = vpop.f32.mrb[6].mxu1  ;;  %v317_v10 = vpop.f32.mrb[2].mxu0 }
 0x2e5   :  { %v2274_v14 = vpop.f32.mrb[7].mxu1  ;;  %v2280_v15 = vpop.f32.mrb[3].mxu0  ;;  %v321_v16 = vsel %vm238_vm2, %v315_v5, -inf  ;;  %v318_v18 = vadd.f32 %v317_v10, %v2862_v17  ;;  %v239_v19 = vsel %vm238_vm2, %v232_v13, -inf  ;;  %v2867_v23 = vadd.f32 %v234_v8, %v2862_v17 }
 0x2e6   :  { %322 = vmax.xlane.f32.xlu1 %v321_v16  ;;  %v347_v14 = vmul.f32 %v2890_v39, %v2801_v44 }
 0x2e7   :  { %v324_v25 = vsel %vm238_vm2, %v318_v18, -inf  ;;  %v242_v27 = vsel %vm238_vm2, %v2867_v23, -inf }
 0x2ea   :  { %v492_v20 = vpop.f32.mrb[4].mxu0  ;;  %240 = vmax.xlane.f32.xlu1 %v239_v19 }
 0x2eb   :  { %v2297_v21 = vpop.f32.mrb[5].mxu0  ;;  %v2871_v26 = vadd.f32 %v492_v20, %v2854_v2  ;;  %v266_v20 = vmul.f32 %v2892_v40, %v2803_v45 }
 0x2ec   :  { %v495_v22 = vpop.f32.mrb[6].mxu0  ;;  %v265_v21 = vmul.f32 %v2892_v40, %v2801_v44 }
 0x2ed   :  { %v2298_v24 = vpop.f32.mrb[7].mxu0  ;;  %v2877_v32 = vadd.f32 %v495_v22, %v2862_v17  ;;  %v499_v35 = vsel %vm238_vm2, %v2871_v26, -inf }
 0x2ee   :  { %325 = vmax.xlane.f32.xlu1 %v324_v25  ;;  %v267_v25 = vpack.c.bf16 %v266_v20, %v265_v21 }
 0x2ef   :  { %v502_v37 = vsel %vm238_vm2, %v2877_v32, -inf }
 0x2f2   :  { %v624_v28 = vpop.f32.mrb[8].mxu0  ;;  %243 = vmax.xlane.f32.xlu1 %v242_v27 }
 0x2f3   :  { %v625_v29 = vadd.f32 %v624_v28, %v2854_v2  ;;  %v2309_v30 = vpop.f32.mrb[9].mxu0 }
 0x2f4   :  { %v627_v31 = vpop.f32.mrb[10].mxu0 }
 0x2f5   :  { %v2310_v33 = vpop.f32.mrb[11].mxu0  ;;  %v631_v34 = vsel %vm238_vm2, %v625_v29, -inf  ;;  %v628_v36 = vadd.f32 %v627_v31, %v2862_v17 }
 0x2f6   :  { %632 = vmax.xlane.f32.xlu0 %v631_v34  ;;  %500 = vmax.xlane.f32.xlu1 %v499_v35 }
 0x2f7   :  { %v634_v38 = vsel %vm238_vm2, %v628_v36, -inf }
 0x2fa   :  { %503 = vmax.xlane.f32.xlu1 %v502_v37 }
 0x2fe   :  { %635 = vmax.xlane.f32.xlu1 %v634_v38 }
 0x30c   :  { %654 = vrot.lane.b32.xlu0 %v2841_v60, %s2633_s27 }
 0x30f   :  { %522 = vrot.lane.b32.xlu1 %v2826_v56, %s2633_s27 }
 0x373   :  { %v323_v41 = vpop.xlane.xlu1 %322 }
 0x374   :  { %v327_v42 = vsub.f32 %v315_v5, %v323_v41 }
 0x376   :  { %v329_v43 = vmul.f32 1.442695, %v327_v42 }
 0x377   :  { %v241_v46 = vpop.xlane.xlu1 %240 }
 0x378   :  { %2519 = vpow2.f32 %v329_v43  ;;  %v245_v47 = vsub.f32 %v232_v13, %v241_v46  ;;  %v348_v13 = vmul.f32 %v2890_v39, %v2803_v45  ;;  %v2487_v46 = vld [vmem:[%s3387_s7] sm:$0xff]  }
 0x379   :  { %2318 = vmatpush3.bf16.msra.mxu0 %v2487_v46 }
 0x37a   :  { %v247_v48 = vmul.f32 1.442695, %v245_v47  ;;  %2319 = vmatprep.subr.bf16.mxu0 %v2631_v9 }
 0x37b   :  { %v326_v49 = vpop.xlane.xlu1 %325 }
 0x37c   :  { %2521 = vpow2.f32 %v247_v48  ;;  %v328_v50 = vsub.f32 %v318_v18, %v326_v49  ;;  %v349_v18 = vpack.c.bf16 %v348_v13, %v347_v14 }
 0x37e   :  { %v331_v51 = vmul.f32 1.442695, %v328_v50 }
 0x37f   :  { %v244_v52 = vpop.xlane.xlu1 %243 }
 0x380   :  { %2523 = vpow2.f32 %v331_v51  ;;  %v246_v19 = vsub.f32 %v2867_v23, %v244_v52 }
 0x382   :  { %v2894_v53 = vpop.eup %2519  ;;  %v249_v22 = vmul.f32 1.442695, %v246_v19 }
 0x383   :  { %v633_v54 = vpop.xlane.xlu0 %632  ;;  %v501_v55 = vpop.xlane.xlu1 %500  ;;  %v333_v57 = vsel %vm238_vm2, %v2894_v53, 0.0 }
 0x384   :  { %v637_v58 = vsub.f32 %v625_v29, %v633_v54  ;;  %334 = vadd.xlane.f32.xlu0 %v333_v57  ;;  %v505_v24 = vsub.f32 %v2871_v26, %v501_v55 }
 0x386   :  { %v2898_v59 = vpop.eup %2521  ;;  %v639_v61 = vmul.f32 1.442695, %v637_v58  ;;  %v507_v27 = vmul.f32 1.442695, %v505_v24 }
 0x387   :  { %v504_v62 = vpop.xlane.xlu1 %503  ;;  %v251_v63 = vsel %vm238_vm2, %v2898_v59, 0.0  ;;  %v2936_v37 = vpop.permute.xlu0 %654 }
 0x388   :  { %2525 = vpow2.f32 %v639_v61  ;;  %252 = vadd.xlane.f32.xlu0 %v251_v63  ;;  %v506_v28 = vsub.f32 %v2877_v32, %v504_v62  ;;  %v657_v38 = vmul.f32 %v2936_v37, %v2801_v44  ;;  %v658_v41 = vmul.f32 %v2936_v37, %v2803_v45 }
 0x38a   :  { %v2902_v3 = vpop.eup %2523  ;;  %v509_v29 = vmul.f32 1.442695, %v506_v28  ;;  %v659_v43 = vpack.c.bf16 %v658_v41, %v657_v38 }
 0x38b   :  { %v636_v4 = vpop.xlane.xlu1 %635  ;;  %v336_v5 = vsel %vm238_vm2, %v2902_v3, 0.0 }
 0x38c   :  { %v638_v6 = vsub.f32 %v628_v36, %v636_v4  ;;  %337 = vadd.xlane.f32.xlu1 %v336_v5 }
 0x38e   :  { %v641_v7 = vmul.f32 1.442695, %v638_v6 }
 0x38f   :  { %v2930_v35 = vpop.permute.xlu1 %522 }
 0x390   :  { %2527 = vpow2.f32 %v641_v7  ;;  %v525_v32 = vmul.f32 %v2930_v35, %v2801_v44  ;;  %v526_v36 = vmul.f32 %v2930_v35, %v2803_v45 }
 0x391   :  { %2529 = vpow2.f32 %v249_v22 }
 0x392   :  { %v2906_v8 = vpop.eup %2525  ;;  %2531 = vpow2.f32 %v507_v27  ;;  %v527_v42 = vpack.c.bf16 %v526_v36, %v525_v32 }
 0x393   :  { %v643_v10 = vsel %vm238_vm2, %v2906_v8, 0.0  ;;  %2533 = vpow2.f32 %v509_v29 }
 0x394   :  { %644 = vadd.xlane.f32.xlu0 %v643_v10 }
 0x39a   :  { %v2914_v15 = vpop.eup %2527 }
 0x39b   :  { %v646_v16 = vsel %vm238_vm2, %v2914_v15, 0.0  ;;  %v2530_v23 = vpop.eup %2529 }
 0x39c   :  { %647 = vadd.xlane.f32.xlu0 %v646_v16  ;;  %v254_v30 = vsel %vm238_vm2, %v2530_v23, 0.0  ;;  %v2532_v31 = vpop.eup %2531 }
 0x39d   :  { %352 = vrot.lane.b32.xlu1 %v349_v18, %s2633_s27  ;;  %v511_v33 = vsel %vm238_vm2, %v2532_v31, 0.0  ;;  %v2534_v34 = vpop.eup %2533 }
 0x39e   :  { %v514_v26 = vsel %vm238_vm2, %v2534_v34, 0.0 }
 0x3b2   :  { %400 = vrot.lane.b32.xlu0 %v267_v25, %s2633_s27  ;;  %v2488_v25 = vld [vmem:[%s3387_s7 + $0x8] sm:$0xff]  }
 0x3b3   :  { %2320 = vmatpush3.bf16.msra.mxu0 %v2488_v25  ;;  %v2494_v25 = vld [vmem:[%s3393_s13 + $0x18] sm:$0xff]  }
 0x3b4   :  { %2325 = vmatprep.subr.bf16.mxu0 %v2631_v9 }
 0x3c1   :  { %255 = vadd.xlane.f32.xlu1 %v254_v30 }
 0x3c5   :  { %512 = vadd.xlane.f32.xlu1 %v511_v33 }
 0x3c9   :  { %515 = vadd.xlane.f32.xlu1 %v514_v26 }
 0x3da   :  { %530 = vrot.lane.b32.xlu1 %v527_v42, %s2633_s27 }
 0x3de   :  { %662 = vrot.lane.b32.xlu1 %v659_v43, %s2633_s27 }
 0x411   :  { %v335_v47 = vpop.xlane.xlu0 %334 }
 0x412   :  { %2535 = vrcp.f32 %v335_v47  ;;  %v2489_v47 = vld [vmem:[%s3391_s11] sm:$0xff]  }
 0x415   :  { %v253_v45 = vpop.xlane.xlu0 %252 }
 0x419   :  { %v338_v48 = vpop.xlane.xlu1 %337 }
 0x41a   :  { %2537 = vrcp.f32 %v338_v48  ;;  %v2490_v48 = vld [vmem:[%s3391_s11 + $0x8] sm:$0xff]  }
 0x41b   :  { %2539 = vrcp.f32 %v253_v45  ;;  %v2492_v45 = vld [vmem:[%s3393_s13 + $0x8] sm:$0xff]  }
 0x41c   :  { %v2536_v49 = vpop.eup %2535 }
 0x41d   :  { %v353_v44 = vpop.permute.xlu1 %352  ;;  %v341_v51 = vmul.f32 %v2536_v49, %v2894_v53 }
 0x41e   :  { %2282 = vmatpush3.bf16.msra.mxu1 %v353_v44  ;;  %v2491_v44 = vld [vmem:[%s3393_s13] sm:$0xff]  }
 0x41f   :  { %2287 = vmatprep.subr.bf16.mxu1 %v2631_v9 }
 0x421   :  { %v645_v54 = vpop.xlane.xlu0 %644 }
 0x424   :  { %v2538_v50 = vpop.eup %2537 }
 0x425   :  { %v342_v52 = vmul.f32 %v2538_v50, %v2902_v3  ;;  %v2540_v53 = vpop.eup %2539 }
 0x426   :  { %v259_v4 = vmul.f32 %v2540_v53, %v2898_v59 }
 0x427   :  { %v350_v55 = vpack.c.bf16 %v342_v52, %v341_v51 }
 0x429   :  { %v648_v57 = vpop.xlane.xlu0 %647  ;;  %2284 = vmatmul.mubr.msk.bf16.vlgmr.msra.gmra.mrb[8].mxu1 %vm238_vm2, %v350_v55 }
 0x42a   :  { %2289 = vmatprep.mubr.msk.bf16.mxu1 %vm2632_vm1, %v2631_v9 }
 0x42d   :  { %v401_v58 = vpop.permute.xlu0 %400 }
 0x42e   :  { %2288 = vmatpush3.bf16.msra.mxu1 %v401_v58 }
 0x42f   :  { %2299 = vmatprep.subr.bf16.mxu1 %v2631_v9 }
 0x44e   :  { %v256_v61 = vpop.xlane.xlu1 %255 }
 0x44f   :  { %2541 = vrcp.f32 %v256_v61 }
 0x452   :  { %v513_v62 = vpop.xlane.xlu1 %512 }
 0x456   :  { %v516_v63 = vpop.xlane.xlu1 %515 }
 0x457   :  { %2543 = vrcp.f32 %v516_v63 }
 0x458   :  { %2545 = vrcp.f32 %v513_v62 }
 0x459   :  { %v2542_v3 = vpop.eup %2541  ;;  %2547 = vrcp.f32 %v648_v57 }
 0x45a   :  { %v260_v5 = vmul.f32 %v2542_v3, %v2530_v23  ;;  %v531_v7 = vpop.permute.xlu1 %530  ;;  %2549 = vrcp.f32 %v645_v54 }
 0x45c   :  { %v268_v6 = vpack.c.bf16 %v260_v5, %v259_v4 }
 0x45e   :  { %2290 = vmatmul.mubr.msk.bf16.vlgmr.msra.gmra.mrb[8].mxu1 %vm238_vm2, %v268_v6  ;;  %v663_v19 = vpop.permute.xlu1 %662 }
 0x45f   :  { %2300 = vmatpush3.bf16.msra.mxu1 %v531_v7  ;;  %2301 = vmatprep.mubr.msk.bf16.mxu1 %vm2632_vm1, %v2631_v9 }
 0x460   :  { %2311 = vmatprep.subr.bf16.mxu1 %v2631_v9 }
 0x461   :  { %v2544_v10 = vpop.eup %2543 }
 0x462   :  { %v2546_v13 = vpop.eup %2545  ;;  %v520_v14 = vmul.f32 %v2544_v10, %v2534_v34  ;;  %v2109_v10 = vld [vmem:[%s3389_s9] ss:$0 sm:$0xff] }
 0x463   :  { %v519_v16 = vmul.f32 %v2546_v13, %v2532_v31  ;;  %v2548_v59 = vpop.eup %2547 }
 0x464   :  { %v2550_v20 = vpop.eup %2549  ;;  %v652_v21 = vmul.f32 %v2548_v59, %v2914_v15 }
 0x465   :  { %v528_v18 = vpack.c.bf16 %v520_v14, %v519_v16  ;;  %v651_v22 = vmul.f32 %v2550_v20, %v2906_v8  ;;  %v2105_v8 = vld [vmem:[%s3388_s8] ss:$0 sm:$0xff] }
 0x467   :  { %v660_v24 = vpack.c.bf16 %v652_v21, %v651_v22 }
 0x46a   :  { %2302 = vmatmul.mubr.msk.bf16.vlgmr.msra.gmra.mrb[8].mxu1 %vm238_vm2, %v528_v18 }
 0x46b   :  { %2312 = vmatpush3.bf16.msra.mxu1 %v663_v19  ;;  %2313 = vmatprep.mubr.msk.bf16.mxu1 %vm2632_vm1, %v2631_v9  ;;  %v2110_v19 = vld [vmem:[%s3390_s10] ss:$0 sm:$0xff] }
 0x46c   :  { %2333 = vmatprep.subr.bf16.mxu1 %v2631_v9 }
 0x476   :  { %2314 = vmatmul.mubr.msk.bf16.vlgmr.msra.gmra.mrb[8].mxu1 %vm238_vm2, %v660_v24  ;;  %v2493_v24 = vld [vmem:[%s3393_s13 + $0x10] sm:$0xff]  }
 0x477   :  { %2349 = vmatprep.mubr.msk.bf16.mxu1 %vm2632_vm1, %v2631_v9  ;;  %2334 = vmatpush3.bf16.msra.mxu1 %v2491_v44 }
 0x478   :  { %2335 = vmatprep.subr.bf16.mxu1 %v2631_v9 }
 0x47b   :  { %2336 = vmatpush3.bf16.msra.mxu1 %v2492_v45 }
 0x47c   :  { %2337 = vmatprep.subr.bf16.mxu1 %v2631_v9 }
 0x47f   :  { %2338 = vmatpush3.bf16.msra.mxu1 %v2493_v24 }
 0x480   :  { %2339 = vmatprep.subr.bf16.mxu1 %v2631_v9 }
 0x483   :  { %2340 = vmatpush3.bf16.msra.mxu1 %v2494_v25 }
 0x484   :  { %2341 = vmatprep.subr.bf16.mxu1 %v2631_v9 }
 0x549   :  { %v702_v27 = vpop.f32.mrb[8].mxu1 }
 0x54a   :  { %v2315_v28 = vpop.f32.mrb[9].mxu1 }
 0x54b   :  { %v705_v29 = vpop.f32.mrb[10].mxu1  ;;  %v2496_v28 = vld [vmem:[%s3393_s13 + $0x28] sm:$0xff]  }
 0x54c   :  { %v711_v23 = vpack.c.bf16 %v705_v29, %v702_v27  ;;  %v2316_v15 = vpop.f32.mrb[11].mxu1  ;;  %v2495_v27 = vld [vmem:[%s3393_s13 + $0x20] sm:$0xff]   ;;  %v2497_v29 = vld [vmem:[%s3393_s13 + $0x30] sm:$0xff]  }
 0x54d   :  { %2342 = vmatpush3.bf16.msra.mxu1 %v2495_v27  ;;  %v2111_v15 = vld [vmem:[%s3392_s12] ss:$0 sm:$0xff] }
 0x54e   :  { %2322 = vmatmul.mubr.msk.bf16.vlgmr.msra.gmra.mrb[12].mxu0 %vm69_vm0, %v711_v23  ;;  %2343 = vmatprep.subr.bf16.mxu1 %v2631_v9  ;;  %v2498_v23 = vld [vmem:[%s3393_s13 + $0x38] sm:$0xff]  }
 0x54f   :  { %2329 = vmatprep.mubr.msk.bf16.mxu0 %vm2632_vm1, %v2631_v9  ;;  %2326 = vmatpush3.bf16.msra.mxu0 %v2489_v47 }
 0x550   :  { %2327 = vmatprep.subr.bf16.mxu0 %v2631_v9 }
 0x551   :  { %2344 = vmatpush3.bf16.msra.mxu1 %v2496_v28 }
 0x552   :  { %2345 = vmatprep.subr.bf16.mxu1 %v2631_v9 }
 0x553   :  { %2328 = vmatpush3.bf16.msra.mxu0 %v2490_v48 }
 0x554   :  { %2353 = vmatprep.subr.bf16.mxu0 %v2631_v9 }
 0x555   :  { %2346 = vmatpush3.bf16.msra.mxu1 %v2497_v29 }
 0x556   :  { %2347 = vmatprep.subr.bf16.mxu1 %v2631_v9 }
 0x559   :  { %2348 = vmatpush3.bf16.msra.mxu1 %v2498_v23 }
 0x55a   :  { %2385 = vmatprep.subr.bf16.mxu1 %v2631_v9 }
 0x621   :  { %v770_v30 = vpop.f32.mrb[12].mxu0 }
 0x622   :  { %v771_v31 = vadd.f32 %v2105_v8, %v770_v30  ;;  %v2323_v33 = vpop.f32.mrb[13].mxu0 }
 0x623   :  { %v773_v34 = vpop.f32.mrb[14].mxu0 }
 0x624   :  { %v2980_v26 = vadd.f32 %v771_v31, %v2742_v0  ;;  %v774_v32 = vadd.f32 %v2105_v8, %v773_v34  ;;  %v2324_v36 = vpop.f32.mrb[15].mxu0 }
 0x626   :  { %v2983_v38 = vadd.f32 %v774_v32, %v2747_v1  ;;  %v781_v41 = vsel %vm69_vm0, %v2980_v26, 0.0  ;;  %v789_v42 = vmul.f32 %v2980_v26, %v2980_v26 }
 0x627   :  { %782 = vadd.xlane.f32.xlu1 %v781_v41 }
 0x628   :  { %v784_v43 = vsel %vm69_vm0, %v2983_v38, 0.0  ;;  %v791_v46 = vsel %vm69_vm0, %v789_v42, 0.0  ;;  %v790_v0 = vmul.f32 %v2983_v38, %v2983_v38 }
 0x629   :  { %785 = vadd.xlane.f32.xlu0 %v784_v43 }
 0x62a   :  { %v794_v1 = vsel %vm69_vm0, %v790_v0, 0.0 }
 0x62b   :  { %792 = vadd.xlane.f32.xlu1 %v791_v46 }
 0x62f   :  { %795 = vadd.xlane.f32.xlu1 %v794_v1 }
 0x6b4   :  { %v783_v49 = vpop.xlane.xlu1 %782 }
 0x6b5   :  { %v787_v50 = vmul.f32 0.03125, %v783_v49  ;;  %v2115_v49 = vld [vmem:[%s3394_s14] ss:$0 sm:$0xff] }
 0x6b6   :  { %v786_v51 = vpop.xlane.xlu0 %785 }
 0x6b7   :  { %v799_v54 = vmul.f32 %v787_v50, %v787_v50  ;;  %v788_v55 = vmul.f32 0.03125, %v786_v51  ;;  %v803_v5 = vsub.f32 %v2980_v26, %v787_v50 }
 0x6b8   :  { %v793_v52 = vpop.xlane.xlu1 %792 }
 0x6b9   :  { %v797_v57 = vmul.f32 0.03125, %v793_v52  ;;  %v800_v62 = vmul.f32 %v788_v55, %v788_v55  ;;  %v804_v13 = vsub.f32 %v2983_v38, %v788_v55 }
 0x6bb   :  { %v801_v58 = vsub.f32 %v797_v57, %v799_v54 }
 0x6bc   :  { %v796_v61 = vpop.xlane.xlu1 %795 }
 0x6bd   :  { %v805_v63 = vadd.f32 1e-05, %v801_v58  ;;  %v798_v53 = vmul.f32 0.03125, %v796_v61 }
 0x6bf   :  { %2551 = vrsqrt.f32 %v805_v63  ;;  %v802_v3 = vsub.f32 %v798_v53, %v800_v62 }
 0x6c1   :  { %v806_v4 = vadd.f32 1e-05, %v802_v3 }
 0x6c3   :  { %2553 = vrsqrt.f32 %v806_v4  ;;  %v2499_v4 = vld [vmem:[%s3385_s5 + $0x10] sm:$0xff]  }
 0x6c9   :  { %v2552_v6 = vpop.eup %2551 }
 0x6ca   :  { %v809_v7 = vmul.f32 %v2552_v6, %v803_v5  ;;  %v2500_v5 = vld [vmem:[%s3385_s5 + $0x18] sm:$0xff]  }
 0x6cc   :  { %v815_v18 = vmul.f32 %v2109_v10, %v809_v7 }
 0x6cd   :  { %v2554_v14 = vpop.eup %2553 }
 0x6ce   :  { %v810_v16 = vmul.f32 %v2554_v14, %v804_v13  ;;  %v3019_v20 = vadd.f32 %v2110_v19, %v815_v18 }
 0x6d0   :  { %v816_v59 = vmul.f32 %v2109_v10, %v810_v16 }
 0x6d2   :  { %v3021_v21 = vadd.f32 %v2110_v19, %v816_v59 }
 0x6d4   :  { %v823_v22 = vpack.c.bf16 %v3021_v21, %v3019_v20 }
 0x6d6   :  { %2330 = vmatmul.mubr.msk.bf16.vlgmr.msra.gmra.mrb[16].mxu0 %vm69_vm0, %v823_v22 }
 0x6d7   :  { %2357 = vmatprep.mubr.msk.bf16.mxu0 %vm2632_vm1, %v2631_v9  ;;  %2354 = vmatpush3.bf16.msra.mxu0 %v2499_v4 }
 0x6d8   :  { %2355 = vmatprep.subr.bf16.mxu0 %v2631_v9 }
 0x6db   :  { %2356 = vmatpush3.bf16.msra.mxu0 %v2500_v5 }
 0x6dc   :  { %2361 = vmatprep.subr.bf16.mxu0 %v2631_v9 }
 0x7a9   :  { %v882_v8 = vpop.f32.mrb[16].mxu0 }
 0x7aa   :  { %v883_v30 = vadd.f32 %v2111_v15, %v882_v8  ;;  %v2331_v31 = vpop.f32.mrb[17].mxu0 }
 0x7ab   :  { %v885_v33 = vpop.f32.mrb[18].mxu0 }
 0x7ac   :  { %v891_v34 = vmul.f32 0.70710677, %v883_v30  ;;  %v886_v32 = vadd.f32 %v2111_v15, %v885_v33  ;;  %v2332_v36 = vpop.f32.mrb[19].mxu0  ;;  %v889_v0 = vmul.f32 0.5, %v883_v30  ;;  %v2124_v15 = vld [vmem:[%s3410_s20 + $0x1] ss:$0 sm:$0xff] }
 0x7ae   :  { %2555 = verf.f32 %v891_v34  ;;  %v892_v41 = vmul.f32 0.70710677, %v886_v32  ;;  %v890_v1 = vmul.f32 0.5, %v886_v32  ;;  %v2125_v32 = vld [vmem:[%s3384_s4 + $0x1] ss:$0 sm:$0xff] }
 0x7b0   :  { %2557 = verf.f32 %v892_v41 }
 0x7b8   :  { %v2556_v42 = vpop.eup %2555 }
 0x7b9   :  { %v895_v43 = vadd.f32 1.0, %v2556_v42 }
 0x7ba   :  { %v2558_v46 = vpop.eup %2557 }
 0x7bb   :  { %v896_v47 = vadd.f32 1.0, %v2558_v46  ;;  %v897_v48 = vmul.f32 %v895_v43, %v889_v0  ;;  %v2130_v46 = vld [vmem:[%s3386_s6 + $0x1] ss:$0 sm:$0xff] }
 0x7bd   :  { %v898_v44 = vmul.f32 %v896_v47, %v890_v1 }
 0x7bf   :  { %v899_v45 = vpack.c.bf16 %v898_v44, %v897_v48 }
 0x7c1   :  { %2350 = vmatmul.mubr.bf16.vlgmr.msra.gmra.mrb[12].mxu1 %v899_v45 }
 0x7c2   :  { %2387 = vmatprep.mubr.msk.bf16.mxu1 %vm2632_vm1, %v2631_v9 }
 0x894   :  { %v1003_v50 = vpop.f32.mrb[12].mxu1 }
 0x895   :  { %v3060_v51 = vadd.f32 %v2115_v49, %v1003_v50  ;;  %v2351_v52 = vpop.f32.mrb[13].mxu1 }
 0x896   :  { %v1006_v54 = vpop.f32.mrb[14].mxu1 }
 0x897   :  { %v3064_v55 = vadd.f32 %v3060_v51, %v2980_v26  ;;  %v3066_v57 = vadd.f32 %v2115_v49, %v1006_v54  ;;  %v2352_v58 = vpop.f32.mrb[15].mxu1 }
 0x899   :  { %v3070_v61 = vadd.f32 %v3066_v57, %v2983_v38  ;;  %v1014_v62 = vsel %vm69_vm0, %v3064_v55, 0.0  ;;  %v1022_v63 = vmul.f32 %v3064_v55, %v3064_v55 }
 0x89a   :  { %1015 = vadd.xlane.f32.xlu1 %v1014_v62 }
 0x89b   :  { %v1017_v53 = vsel %vm69_vm0, %v3070_v61, 0.0  ;;  %v1023_v26 = vmul.f32 %v3070_v61, %v3070_v61  ;;  %v1024_v3 = vsel %vm69_vm0, %v1022_v63, 0.0 }
 0x89c   :  { %1018 = vadd.xlane.f32.xlu0 %v1017_v53 }
 0x89d   :  { %v1027_v38 = vsel %vm69_vm0, %v1023_v26, 0.0 }
 0x89e   :  { %1025 = vadd.xlane.f32.xlu1 %v1024_v3 }
 0x8a0   :  { %1028 = vadd.xlane.f32.xlu0 %v1027_v38 }
 0x927   :  { %v1016_v6 = vpop.xlane.xlu1 %1015 }
 0x928   :  { %v1020_v7 = vmul.f32 0.03125, %v1016_v6 }
 0x929   :  { %v1019_v10 = vpop.xlane.xlu0 %1018 }
 0x92a   :  { %v1021_v13 = vmul.f32 0.03125, %v1019_v10  ;;  %v1032_v16 = vmul.f32 %v1020_v7, %v1020_v7  ;;  %v1036_v29 = vsub.f32 %v3064_v55, %v1020_v7 }
 0x92b   :  { %v1026_v14 = vpop.xlane.xlu1 %1025 }
 0x92c   :  { %v1030_v18 = vmul.f32 0.03125, %v1026_v14  ;;  %v1033_v59 = vmul.f32 %v1021_v13, %v1021_v13  ;;  %v1037_v8 = vsub.f32 %v3070_v61, %v1021_v13 }
 0x92d   :  { %v1029_v19 = vpop.xlane.xlu0 %1028 }
 0x92e   :  { %v1034_v22 = vsub.f32 %v1030_v18, %v1032_v16  ;;  %v1031_v24 = vmul.f32 0.03125, %v1029_v19 }
 0x930   :  { %v1038_v25 = vadd.f32 1e-05, %v1034_v22  ;;  %v1035_v27 = vsub.f32 %v1031_v24, %v1033_v59 }
 0x932   :  { %2559 = vrsqrt.f32 %v1038_v25  ;;  %v1039_v28 = vadd.f32 1e-05, %v1035_v27 }
 0x934   :  { %2561 = vrsqrt.f32 %v1039_v28 }
 0x93c   :  { %v2560_v23 = vpop.eup %2559 }
 0x93d   :  { %v1042_v30 = vmul.f32 %v2560_v23, %v1036_v29 }
 0x93e   :  { %v2562_v31 = vpop.eup %2561 }
 0x93f   :  { %v1043_v33 = vmul.f32 %v2562_v31, %v1037_v8  ;;  %v1048_v34 = vmul.f32 %v2124_v15, %v1042_v30 }
 0x941   :  { %v1049_v36 = vmul.f32 %v2124_v15, %v1043_v33  ;;  %v1054_v41 = vadd.f32 %v2125_v32, %v1048_v34 }
 0x943   :  { %v1055_v42 = vadd.f32 %v2125_v32, %v1049_v36 }
 0x945   :  { %v1056_v43 = vpack.c.bf16 %v1055_v42, %v1054_v41 }
 0x947   :  { %2358 = vmatmul.mubr.msk.bf16.vlgmr.msra.gmra.mrb[20].mxu0 %vm69_vm0, %v1056_v43 }
 0x948   :  { %2363 = vmatprep.mubr.msk.bf16.mxu0 %vm2632_vm1, %v2631_v9 }
 0xa1a   :  { %v1116_v0 = vpop.f32.mrb[20].mxu0 }
 0xa1b   :  { %v1117_v1 = vadd.f32 %v2130_v46, %v1116_v0  ;;  %v2359_v47 = vpop.f32.mrb[21].mxu0 }
 0xa1c   :  { %v1119_v48 = vpop.f32.mrb[22].mxu0 }
 0xa1d   :  { %v1120_v44 = vadd.f32 %v2130_v46, %v1119_v48  ;;  %v2360_v45 = vpop.f32.mrb[23].mxu0  ;;  %v1124_v49 = vmul.f32 %v2783_v12, %v1117_v1  ;;  %v1372_v50 = vmul.f32 %v2826_v56, %v1117_v1  ;;  %v1203_v52 = vmul.f32 %v2776_v11, %v1117_v1 }
 0xa1e   :  { %v1495_v54 = vmul.f32 %v2841_v60, %v1117_v1  ;;  %v3109_v58 = vmul.f32 %v1117_v1, %v2892_v40  ;;  %v3112_v62 = vmul.f32 %v1117_v1, %v2890_v39  ;;  %v3115_v63 = vmul.f32 %v1117_v1, %v2930_v35 }
 0xa1f   :  { %v1123_v53 = vpack.c.bf16 %v1120_v44, %v1117_v1  ;;  %v1125_v26 = vmul.f32 %v2783_v12, %v1120_v44  ;;  %v1373_v3 = vmul.f32 %v2826_v56, %v1120_v44  ;;  %v1204_v38 = vmul.f32 %v2776_v11, %v1120_v44 }
 0xa20   :  { %v1496_v4 = vmul.f32 %v2841_v60, %v1120_v44  ;;  %v3122_v5 = vmul.f32 %v1120_v44, %v2892_v40  ;;  %v3125_v6 = vmul.f32 %v1120_v44, %v2890_v39  ;;  %v3128_v7 = vmul.f32 %v1120_v44, %v2930_v35 }
 0xa21   :  { %1128 = vrot.lane.b32.xlu1 %v1123_v53, %s2634_s23  ;;  %v1126_v10 = vpack.c.bf16 %v1125_v26, %v1124_v49  ;;  %v1374_v13 = vpack.c.bf16 %v1373_v3, %v1372_v50  ;;  %v1205_v12 = vpack.c.bf16 %v1204_v38, %v1203_v52  ;;  %v3138_v39 = vmul.f32 %v1117_v1, %v2936_v37 }
 0xa22   :  { %v1497_v14 = vpack.c.bf16 %v1496_v4, %v1495_v54  ;;  %v1201_v11 = vpack.c.bf16 %v3122_v5, %v3109_v58  ;;  %v1274_v56 = vpack.c.bf16 %v3125_v6, %v3112_v62  ;;  %v1443_v60 = vpack.c.bf16 %v3128_v7, %v3115_v63  ;;  %v2501_v58 = vld [vmem:[%s3387_s7 + $0x10] sm:$0xff]  }
 0xa23   :  { %v3141_v40 = vmul.f32 %v1120_v44, %v2936_v37 }
 0xa25   :  { %v1566_v35 = vpack.c.bf16 %v3141_v40, %v3138_v39 }
 0xa93   :  { %v1129_v16 = vpop.permute.xlu1 %1128 }
 0xa94   :  { %v1134_v18 = vsel %vm69_vm0, %v1129_v16, 0 }
 0xa95   :  { %2362 = vmatpush3.bf16.xpose.msra.mxu0 %v1134_v18  ;;  %2386 = vmatpush3.bf16.xpose.msra.mxu1 %v1134_v18 }
 0xa96   :  { %2367 = vmatprep.subr.bf16.mxu0 %v2631_v9  ;;  %2397 = vmatprep.subr.bf16.mxu1 %v2631_v9 }
 0xa9c   :  { %2364 = vmatmul.mubr.msk.bf16.vlgmr.msra.gmra.mrb[24].mxu0 %vm69_vm0, %v1126_v10  ;;  %2388 = vmatmul.mubr.msk.bf16.vlgmr.msra.gmra.mrb[16].mxu1 %vm69_vm0, %v1374_v13 }
 0xa9d   :  { %2368 = vmatpush3.bf16.xpose.msra.mxu0 %v1134_v18  ;;  %2398 = vmatpush3.bf16.xpose.msra.mxu1 %v1134_v18 }
 0xa9e   :  { %2369 = vmatprep.mubr.msk.bf16.mxu0 %vm2632_vm1, %v2631_v9  ;;  %2399 = vmatprep.mubr.msk.bf16.mxu1 %vm2632_vm1, %v2631_v9 }
 0xa9f   :  { %2373 = vmatprep.subr.bf16.mxu0 %v2631_v9  ;;  %2409 = vmatprep.subr.bf16.mxu1 %v2631_v9 }
 0xaa4   :  { %2370 = vmatmul.mubr.msk.bf16.vlgmr.msra.gmra.mrb[28].mxu0 %vm69_vm0, %v1205_v12  ;;  %2400 = vmatmul.mubr.msk.bf16.vlgmr.msra.gmra.mrb[20].mxu1 %vm69_vm0, %v1497_v14 }
 0xaa5   :  { %2375 = vmatprep.mubr.msk.bf16.mxu0 %vm2632_vm1, %v2631_v9  ;;  %2413 = vmatprep.mubr.msk.bf16.mxu1 %vm2632_vm1, %v2631_v9 }
 0xaa6   :  { %2410 = vmatpush3.bf16.msra.mxu1 %v2501_v58 }
 0xaa7   :  { %2411 = vmatprep.subr.bf16.mxu1 %v2631_v9 }
 0xb6f   :  { %v1170_v37 = vpop.f32.mrb[24].mxu0  ;;  %v1412_v19 = vpop.f32.mrb[16].mxu1 }
 0xb70   :  { %v2365_v59 = vpop.f32.mrb[25].mxu0  ;;  %v2389_v22 = vpop.f32.mrb[17].mxu1  ;;  %v1171_v46 = vadd.f32 %v1170_v37, %v2854_v2  ;;  %v1413_v48 = vadd.f32 %v1412_v19, %v2854_v2 }
 0xb71   :  { %v1173_v24 = vpop.f32.mrb[26].mxu0  ;;  %v1415_v25 = vpop.f32.mrb[18].mxu1 }
 0xb72   :  { %v1416_v27 = vadd.f32 %v1415_v25, %v2862_v17  ;;  %v2366_v28 = vpop.f32.mrb[27].mxu0  ;;  %v2390_v29 = vpop.f32.mrb[19].mxu1  ;;  %v1174_v1 = vadd.f32 %v1173_v24, %v2862_v17  ;;  %v1177_v47 = vsel %vm238_vm2, %v1171_v46, -inf  ;;  %v1419_v49 = vsel %vm238_vm2, %v1413_v48, -inf }
 0xb74   :  { %v1422_v23 = vsel %vm238_vm2, %v1416_v27, -inf  ;;  %v1180_v44 = vsel %vm238_vm2, %v1174_v1, -inf }
 0xb75   :  { %1423 = vmax.xlane.f32.xlu1 %v1422_v23 }
 0xb77   :  { %v1243_v15 = vpop.f32.mrb[28].mxu0  ;;  %v1535_v8 = vpop.f32.mrb[20].mxu1 }
 0xb78   :  { %v1244_v30 = vadd.f32 %v1243_v15, %v2854_v2  ;;  %v2371_v31 = vpop.f32.mrb[29].mxu0  ;;  %v2401_v33 = vpop.f32.mrb[21].mxu1  ;;  %v1536_v45 = vadd.f32 %v1535_v8, %v2854_v2 }
 0xb79   :  { %v1246_v34 = vpop.f32.mrb[30].mxu0  ;;  %v1538_v32 = vpop.f32.mrb[22].mxu1 }
 0xb7a   :  { %v1247_v36 = vadd.f32 %v1246_v34, %v2862_v17  ;;  %v2372_v41 = vpop.f32.mrb[31].mxu0  ;;  %v2402_v42 = vpop.f32.mrb[23].mxu1  ;;  %v1250_v43 = vsel %vm238_vm2, %v1244_v30, -inf  ;;  %v1539_v50 = vadd.f32 %v1538_v32, %v2862_v17  ;;  %v1542_v52 = vsel %vm238_vm2, %v1536_v45, -inf }
 0xb7b   :  { %1251 = vmax.xlane.f32.xlu0 %v1250_v43 }
 0xb7c   :  { %v1253_v0 = vsel %vm238_vm2, %v1247_v36, -inf  ;;  %v1545_v54 = vsel %vm238_vm2, %v1539_v50, -inf }
 0xb7f   :  { %1254 = vmax.xlane.f32.xlu0 %v1253_v0 }
 0xb83   :  { %1178 = vmax.xlane.f32.xlu0 %v1177_v47 }
 0xb87   :  { %1181 = vmax.xlane.f32.xlu0 %v1180_v44 }
 0xb8b   :  { %1420 = vmax.xlane.f32.xlu0 %v1419_v49 }
 0xb8f   :  { %1543 = vmax.xlane.f32.xlu0 %v1542_v52 }
 0xb93   :  { %1546 = vmax.xlane.f32.xlu0 %v1545_v54 }
 0xc02   :  { %v1424_v2 = vpop.xlane.xlu1 %1423 }
 0xc03   :  { %v1426_v16 = vsub.f32 %v1416_v27, %v1424_v2 }
 0xc05   :  { %v1429_v22 = vmul.f32 1.442695, %v1426_v16 }
 0xc08   :  { %v1252_v53 = vpop.xlane.xlu0 %1251 }
 0xc09   :  { %v1256_v24 = vsub.f32 %v1244_v30, %v1252_v53 }
 0xc0b   :  { %v1258_v29 = vmul.f32 1.442695, %v1256_v24 }
 0xc0c   :  { %v1255_v26 = vpop.xlane.xlu0 %1254 }
 0xc0d   :  { %v1257_v23 = vsub.f32 %v1247_v36, %v1255_v26 }
 0xc0f   :  { %v1260_v15 = vmul.f32 1.442695, %v1257_v23 }
 0xc10   :  { %v1179_v3 = vpop.xlane.xlu0 %1178 }
 0xc11   :  { %v1183_v38 = vsub.f32 %v1171_v46, %v1179_v3 }
 0xc13   :  { %v1185_v4 = vmul.f32 1.442695, %v1183_v38 }
 0xc14   :  { %v1182_v10 = vpop.xlane.xlu0 %1181 }
 0xc15   :  { %2563 = vpow2.f32 %v1185_v4  ;;  %v1184_v13 = vsub.f32 %v1174_v1, %v1182_v10 }
 0xc17   :  { %v1187_v18 = vmul.f32 1.442695, %v1184_v13 }
 0xc18   :  { %v1421_v12 = vpop.xlane.xlu0 %1420 }
 0xc19   :  { %v1425_v14 = vsub.f32 %v1413_v48, %v1421_v12 }
 0xc1b   :  { %v1427_v17 = vmul.f32 1.442695, %v1425_v14 }
 0xc1c   :  { %v1544_v37 = vpop.xlane.xlu0 %1543 }
 0xc1d   :  { %2565 = vpow2.f32 %v1427_v17  ;;  %v1548_v19 = vsub.f32 %v1536_v45, %v1544_v37 }
 0xc1e   :  { %2567 = vpow2.f32 %v1187_v18 }
 0xc1f   :  { %v3178_v59 = vpop.eup %2563  ;;  %v1550_v25 = vmul.f32 1.442695, %v1548_v19 }
 0xc20   :  { %v1189_v28 = vsel %vm238_vm2, %v3178_v59, 0.0  ;;  %v1547_v0 = vpop.xlane.xlu0 %1546 }
 0xc21   :  { %2569 = vpow2.f32 %v1550_v25  ;;  %1190 = vadd.xlane.f32.xlu0 %v1189_v28  ;;  %v1549_v1 = vsub.f32 %v1539_v50, %v1547_v0  ;;  %v2503_v0 = vld [vmem:[%s3391_s11 + $0x10] sm:$0xff]  }
 0xc22   :  { %2571 = vpow2.f32 %v1429_v22  ;;  %v2502_v22 = vld [vmem:[%s3387_s7 + $0x18] sm:$0xff]  }
 0xc23   :  { %2573 = vpow2.f32 %v1258_v29  ;;  %v1552_v47 = vmul.f32 1.442695, %v1549_v1  ;;  %2412 = vmatpush3.bf16.msra.mxu1 %v2502_v22  ;;  %v2504_v1 = vld [vmem:[%s3391_s11 + $0x18] sm:$0xff]  }
 0xc24   :  { %2575 = vpow2.f32 %v1260_v15  ;;  %2417 = vmatprep.subr.bf16.mxu1 %v2631_v9 }
 0xc25   :  { %2577 = vpow2.f32 %v1552_v47  ;;  %v2505_v47 = vld [vmem:[%s3393_s13 + $0x40] sm:$0xff]  }
 0xc27   :  { %v3182_v27 = vpop.eup %2565 }
 0xc28   :  { %v1431_v8 = vsel %vm238_vm2, %v3182_v27, 0.0  ;;  %v2568_v31 = vpop.eup %2567 }
 0xc29   :  { %1432 = vadd.xlane.f32.xlu0 %v1431_v8  ;;  %v1192_v34 = vsel %vm238_vm2, %v2568_v31, 0.0 }
 0xc2b   :  { %v3186_v30 = vpop.eup %2569 }
 0xc2c   :  { %v1554_v33 = vsel %vm238_vm2, %v3186_v30, 0.0  ;;  %v3191_v32 = vpop.eup %2571 }
 0xc2d   :  { %1555 = vadd.xlane.f32.xlu1 %v1554_v33  ;;  %1193 = vadd.xlane.f32.xlu0 %v1192_v34  ;;  %v1434_v36 = vsel %vm238_vm2, %v3191_v32, 0.0  ;;  %v2574_v41 = vpop.eup %2573 }
 0xc2e   :  { %v1262_v42 = vsel %vm238_vm2, %v2574_v41, 0.0  ;;  %v2576_v43 = vpop.eup %2575 }
 0xc2f   :  { %v1265_v46 = vsel %vm238_vm2, %v2576_v43, 0.0  ;;  %v2578_v48 = vpop.eup %2577 }
 0xc30   :  { %v1557_v44 = vsel %vm238_vm2, %v2578_v48, 0.0 }
 0xc31   :  { %1435 = vadd.xlane.f32.xlu0 %v1434_v36 }
 0xc35   :  { %1263 = vadd.xlane.f32.xlu0 %v1262_v42 }
 0xc39   :  { %1266 = vadd.xlane.f32.xlu0 %v1265_v46 }
 0xc3e   :  { %1325 = vrot.lane.b32.xlu1 %v1201_v11, %s2633_s27 }
 0xc4f   :  { %1277 = vrot.lane.b32.xlu0 %v1274_v56, %s2633_s27 }
 0xc53   :  { %1446 = vrot.lane.b32.xlu0 %v1443_v60, %s2633_s27 }
 0xc62   :  { %1558 = vadd.xlane.f32.xlu1 %v1557_v44 }
 0xc73   :  { %1569 = vrot.lane.b32.xlu1 %v1566_v35, %s2633_s27 }
 0xcae   :  { %v1191_v62 = vpop.xlane.xlu0 %1190 }
 0xcb6   :  { %v1433_v63 = vpop.xlane.xlu0 %1432 }
 0xcba   :  { %v1194_v5 = vpop.xlane.xlu0 %1193  ;;  %v1556_v39 = vpop.xlane.xlu1 %1555 }
 0xcbe   :  { %v1436_v6 = vpop.xlane.xlu0 %1435  ;;  %v1326_v50 = vpop.permute.xlu1 %1325 }
 0xcc2   :  { %v1264_v7 = vpop.xlane.xlu0 %1263 }
 0xcc3   :  { %2579 = vrcp.f32 %v1264_v7 }
 0xcc6   :  { %v1267_v11 = vpop.xlane.xlu0 %1266 }
 0xcc7   :  { %2581 = vrcp.f32 %v1267_v11 }
 0xcc8   :  { %2583 = vrcp.f32 %v1194_v5 }
 0xcc9   :  { %2585 = vrcp.f32 %v1191_v62 }
 0xcca   :  { %v1278_v56 = vpop.permute.xlu0 %1277  ;;  %2587 = vrcp.f32 %v1436_v6 }
 0xccb   :  { %2374 = vmatpush3.bf16.msra.mxu0 %v1278_v56  ;;  %2589 = vrcp.f32 %v1433_v63 }
 0xccc   :  { %2379 = vmatprep.subr.bf16.mxu0 %v2631_v9  ;;  %2591 = vrcp.f32 %v1556_v39 }
 0xccd   :  { %v2580_v60 = vpop.eup %2579 }
 0xcce   :  { %v1270_v35 = vmul.f32 %v2580_v60, %v2574_v41  ;;  %v1447_v38 = vpop.permute.xlu0 %1446 }
 0xcd1   :  { %v2582_v40 = vpop.eup %2581 }
 0xcd2   :  { %v1271_v45 = vmul.f32 %v2582_v40, %v2576_v43  ;;  %v2584_v52 = vpop.eup %2583 }
 0xcd3   :  { %v2586_v54 = vpop.eup %2585  ;;  %v1198_v53 = vmul.f32 %v2584_v52, %v2568_v31 }
 0xcd4   :  { %v1275_v49 = vpack.c.bf16 %v1271_v45, %v1270_v35  ;;  %v1197_v26 = vmul.f32 %v2586_v54, %v3178_v59  ;;  %v2588_v4 = vpop.eup %2587  ;;  %v2150_v54 = vld [vmem:[%s3389_s9 + $0x1] ss:$0 sm:$0xff] }
 0xcd5   :  { %v2590_v10 = vpop.eup %2589  ;;  %v1440_v13 = vmul.f32 %v2588_v4, %v3191_v32  ;;  %v2151_v4 = vld [vmem:[%s3390_s10 + $0x1] ss:$0 sm:$0xff] }
 0xcd6   :  { %2376 = vmatmul.mubr.msk.bf16.vlgmr.msra.gmra.mrb[32].mxu0 %vm238_vm2, %v1275_v49  ;;  %v1202_v3 = vpack.c.bf16 %v1198_v53, %v1197_v26  ;;  %v1439_v2 = vmul.f32 %v2590_v10, %v3182_v27  ;;  %v2592_v18 = vpop.eup %2591  ;;  %v2146_v27 = vld [vmem:[%s3388_s8 + $0x1] ss:$0 sm:$0xff] }
 0xcd7   :  { %2380 = vmatpush3.bf16.msra.mxu0 %v1326_v50  ;;  %2381 = vmatprep.mubr.msk.bf16.mxu0 %vm2632_vm1, %v2631_v9  ;;  %v1562_v37 = vmul.f32 %v2592_v18, %v3186_v30  ;;  %v2509_v18 = vld [vmem:[%s3393_s13 + $0x60] sm:$0xff]  }
 0xcd8   :  { %2391 = vmatprep.subr.bf16.mxu0 %v2631_v9  ;;  %v1444_v12 = vpack.c.bf16 %v1440_v13, %v1439_v2 }
 0xce2   :  { %2382 = vmatmul.mubr.msk.bf16.vlgmr.msra.gmra.mrb[32].mxu0 %vm238_vm2, %v1202_v3 }
 0xce3   :  { %2392 = vmatpush3.bf16.msra.mxu0 %v1447_v38  ;;  %2393 = vmatprep.mubr.msk.bf16.mxu0 %vm2632_vm1, %v2631_v9 }
 0xce4   :  { %2403 = vmatprep.subr.bf16.mxu0 %v2631_v9 }
 0xcee   :  { %2394 = vmatmul.mubr.msk.bf16.vlgmr.msra.gmra.mrb[32].mxu0 %vm238_vm2, %v1444_v12 }
 0xcef   :  { %v1559_v14 = vpop.xlane.xlu1 %1558  ;;  %2405 = vmatprep.mubr.msk.bf16.mxu0 %vm2632_vm1, %v2631_v9 }
 0xcf0   :  { %2593 = vrcp.f32 %v1559_v14  ;;  %v2507_v14 = vld [vmem:[%s3393_s13 + $0x50] sm:$0xff]  }
 0xcf3   :  { %v1570_v16 = vpop.permute.xlu1 %1569 }
 0xcf4   :  { %2404 = vmatpush3.bf16.msra.mxu0 %v1570_v16  ;;  %v2508_v16 = vld [vmem:[%s3393_s13 + $0x58] sm:$0xff]  }
 0xcf5   :  { %2425 = vmatprep.subr.bf16.mxu0 %v2631_v9 }
 0xcfa   :  { %v2594_v17 = vpop.eup %2593 }
 0xcfb   :  { %v1563_v19 = vmul.f32 %v2594_v17, %v2578_v48  ;;  %v2506_v48 = vld [vmem:[%s3393_s13 + $0x48] sm:$0xff]  }
 0xcfc   :  { %v2510_v17 = vld [vmem:[%s3393_s13 + $0x68] sm:$0xff]  }
 0xcfd   :  { %v1567_v59 = vpack.c.bf16 %v1563_v19, %v1562_v37  ;;  %v2511_v37 = vld [vmem:[%s3393_s13 + $0x70] sm:$0xff]   ;;  %v2512_v19 = vld [vmem:[%s3393_s13 + $0x78] sm:$0xff]  }
 0xcff   :  { %2406 = vmatmul.mubr.msk.bf16.vlgmr.msra.gmra.mrb[32].mxu0 %vm238_vm2, %v1567_v59  ;;  %v2156_v59 = vld [vmem:[%s3392_s12 + $0x1] ss:$0 sm:$0xff] }
 0xd00   :  { %2441 = vmatprep.mubr.msk.bf16.mxu0 %vm2632_vm1, %v2631_v9  ;;  %2426 = vmatpush3.bf16.msra.mxu0 %v2505_v47 }
 0xd01   :  { %2427 = vmatprep.subr.bf16.mxu0 %v2631_v9 }
 0xd04   :  { %2428 = vmatpush3.bf16.msra.mxu0 %v2506_v48 }
 0xd05   :  { %2429 = vmatprep.subr.bf16.mxu0 %v2631_v9 }
 0xd08   :  { %2430 = vmatpush3.bf16.msra.mxu0 %v2507_v14 }
 0xd09   :  { %2431 = vmatprep.subr.bf16.mxu0 %v2631_v9 }
 0xd0c   :  { %2432 = vmatpush3.bf16.msra.mxu0 %v2508_v16 }
 0xd0d   :  { %2433 = vmatprep.subr.bf16.mxu0 %v2631_v9 }
 0xd10   :  { %2434 = vmatpush3.bf16.msra.mxu0 %v2509_v18 }
 0xd11   :  { %2435 = vmatprep.subr.bf16.mxu0 %v2631_v9 }
 0xd14   :  { %2436 = vmatpush3.bf16.msra.mxu0 %v2510_v17 }
 0xd15   :  { %2437 = vmatprep.subr.bf16.mxu0 %v2631_v9 }
 0xd18   :  { %2438 = vmatpush3.bf16.msra.mxu0 %v2511_v37 }
 0xd19   :  { %2439 = vmatprep.subr.bf16.mxu0 %v2631_v9 }
 0xd1c   :  { %2440 = vmatpush3.bf16.msra.mxu0 %v2512_v19 }
 0xdd2   :  { %v1609_v24 = vpop.f32.mrb[32].mxu0 }
 0xdd3   :  { %v2407_v25 = vpop.f32.mrb[33].mxu0 }
 0xdd4   :  { %v1612_v28 = vpop.f32.mrb[34].mxu0 }
 0xdd5   :  { %v1618_v29 = vpack.c.bf16 %v1612_v28, %v1609_v24  ;;  %v2408_v23 = vpop.f32.mrb[35].mxu0 }
 0xdd7   :  { %2414 = vmatmul.mubr.msk.bf16.vlgmr.msra.gmra.mrb[24].mxu1 %vm69_vm0, %v1618_v29 }
 0xdd8   :  { %2421 = vmatprep.mubr.msk.bf16.mxu1 %vm2632_vm1, %v2631_v9  ;;  %2418 = vmatpush3.bf16.msra.mxu1 %v2503_v0 }
 0xdd9   :  { %2419 = vmatprep.subr.bf16.mxu1 %v2631_v9 }
 0xddc   :  { %2420 = vmatpush3.bf16.msra.mxu1 %v2504_v1 }
 0xddd   :  { %2445 = vmatprep.subr.bf16.mxu1 %v2631_v9 }
 0xeaa   :  { %v1678_v15 = vpop.f32.mrb[24].mxu1 }
 0xeab   :  { %v1679_v8 = vadd.f32 %v2146_v27, %v1678_v15  ;;  %v2415_v31 = vpop.f32.mrb[25].mxu1 }
 0xeac   :  { %v1681_v30 = vpop.f32.mrb[26].mxu1 }
 0xead   :  { %v3249_v33 = vadd.f32 %v1679_v8, %v3064_v55  ;;  %v1682_v34 = vadd.f32 %v2146_v27, %v1681_v30  ;;  %v2416_v32 = vpop.f32.mrb[27].mxu1 }
 0xeaf   :  { %v3252_v36 = vadd.f32 %v1682_v34, %v3070_v61  ;;  %v1689_v41 = vsel %vm69_vm0, %v3249_v33, 0.0  ;;  %v1697_v42 = vmul.f32 %v3249_v33, %v3249_v33 }
 0xeb0   :  { %1690 = vadd.xlane.f32.xlu0 %v1689_v41 }
 0xeb1   :  { %v1692_v43 = vsel %vm69_vm0, %v3252_v36, 0.0  ;;  %v1699_v46 = vsel %vm69_vm0, %v1697_v42, 0.0  ;;  %v1698_v55 = vmul.f32 %v3252_v36, %v3252_v36 }
 0xeb2   :  { %1693 = vadd.xlane.f32.xlu1 %v1692_v43 }
 0xeb3   :  { %v1702_v61 = vsel %vm69_vm0, %v1698_v55, 0.0  ;;  %v2176_v55 = vld [vmem:[%s3394_s14 + $0x1] ss:$0 sm:$0xff]  ;;  %s2635_s14 = smov 32  }
 0xeb4   :  { %1700 = vadd.xlane.f32.xlu0 %v1699_v46 }
 0xeb8   :  { %1703 = vadd.xlane.f32.xlu0 %v1702_v61 }
 0xf3d   :  { %v1691_v44 = vpop.xlane.xlu0 %1690 }
 0xf3e   :  { %v1695_v58 = vmul.f32 0.03125, %v1691_v44 }
 0xf3f   :  { %v1694_v62 = vpop.xlane.xlu1 %1693 }
 0xf40   :  { %v1707_v5 = vmul.f32 %v1695_v58, %v1695_v58  ;;  %v1696_v6 = vmul.f32 0.03125, %v1694_v62  ;;  %v1711_v49 = vsub.f32 %v3249_v33, %v1695_v58 }
 0xf41   :  { %v1701_v63 = vpop.xlane.xlu0 %1700 }
 0xf42   :  { %v1705_v7 = vmul.f32 0.03125, %v1701_v63  ;;  %v1708_v60 = vmul.f32 %v1696_v6, %v1696_v6  ;;  %v1712_v53 = vsub.f32 %v3252_v36, %v1696_v6 }
 0xf44   :  { %v1709_v11 = vsub.f32 %v1705_v7, %v1707_v5 }
 0xf45   :  { %v1704_v56 = vpop.xlane.xlu0 %1703 }
 0xf46   :  { %v1713_v39 = vadd.f32 1e-05, %v1709_v11  ;;  %v1706_v40 = vmul.f32 0.03125, %v1704_v56 }
 0xf48   :  { %2595 = vrsqrt.f32 %v1713_v39  ;;  %v1710_v35 = vsub.f32 %v1706_v40, %v1708_v60 }
 0xf4a   :  { %v1714_v45 = vadd.f32 1e-05, %v1710_v35 }
 0xf4c   :  { %2597 = vrsqrt.f32 %v1714_v45 }
 0xf52   :  { %v2596_v50 = vpop.eup %2595 }
 0xf53   :  { %v1717_v52 = vmul.f32 %v2596_v50, %v1711_v49 }
 0xf55   :  { %v1723_v38 = vmul.f32 %v2150_v54, %v1717_v52 }
 0xf56   :  { %v2598_v26 = vpop.eup %2597 }
 0xf57   :  { %v1718_v3 = vmul.f32 %v2598_v26, %v1712_v53  ;;  %v3288_v13 = vadd.f32 %v2151_v4, %v1723_v38 }
 0xf59   :  { %v1724_v10 = vmul.f32 %v2150_v54, %v1718_v3 }
 0xf5b   :  { %v3290_v2 = vadd.f32 %v2151_v4, %v1724_v10 }
 0xf5d   :  { %v1731_v12 = vpack.c.bf16 %v3290_v2, %v3288_v13 }
 0xf5f   :  { %2422 = vmatmul.mubr.msk.bf16.vlgmr.msra.gmra.mrb[28].mxu1 %vm69_vm0, %v1731_v12 }
 0xf60   :  { %2449 = vmatprep.mubr.msk.bf16.mxu1 %vm2632_vm1, %v2631_v9 }
0x1032   :  { %v1791_v22 = vpop.f32.mrb[28].mxu1 }
0x1033   :  { %v1792_v24 = vadd.f32 %v2156_v59, %v1791_v22  ;;  %v2423_v25 = vpop.f32.mrb[29].mxu1 }
0x1034   :  { %v1794_v28 = vpop.f32.mrb[30].mxu1 }
0x1035   :  { %v1800_v29 = vmul.f32 0.70710677, %v1792_v24  ;;  %v1795_v23 = vadd.f32 %v2156_v59, %v1794_v28  ;;  %v2424_v27 = vpop.f32.mrb[31].mxu1  ;;  %v1798_v34 = vmul.f32 0.5, %v1792_v24 }
0x1037   :  { %2599 = verf.f32 %v1800_v29  ;;  %v1801_v15 = vmul.f32 0.70710677, %v1795_v23  ;;  %v1799_v32 = vmul.f32 0.5, %v1795_v23 }
0x1039   :  { %2601 = verf.f32 %v1801_v15 }
0x1041   :  { %v2600_v8 = vpop.eup %2599 }
0x1042   :  { %v1804_v31 = vadd.f32 1.0, %v2600_v8 }
0x1043   :  { %v2602_v30 = vpop.eup %2601 }
0x1044   :  { %v1805_v41 = vadd.f32 1.0, %v2602_v30  ;;  %v1806_v42 = vmul.f32 %v1804_v31, %v1798_v34 }
0x1046   :  { %v1807_v43 = vmul.f32 %v1805_v41, %v1799_v32 }
0x1048   :  { %v1808_v46 = vpack.c.bf16 %v1807_v43, %v1806_v42 }
0x104a   :  { %2442 = vmatmul.mubr.bf16.vlgmr.msra.gmra.mrb[36].mxu0 %v1808_v46 }
0x111d   :  { %v1913_v61 = vpop.f32.mrb[36].mxu0 }
0x111e   :  { %v1914_v0 = vadd.f32 %v2176_v55, %v1913_v61  ;;  %v2443_v1 = vpop.f32.mrb[37].mxu0 }
0x111f   :  { %v1916_v47 = vpop.f32.mrb[38].mxu0 }
0x1120   :  { %v1920_v48 = vadd.f32 %v1914_v0, %v3249_v33  ;;  %v1917_v44 = vadd.f32 %v2176_v55, %v1916_v47  ;;  %v2444_v58 = vpop.f32.mrb[39].mxu0  ;;  %v2513_v33 = vld [vmem:[%s3397_s17] sm:$0xff]  }
0x1121   :  { %2446 = vmatpush3.bf16.msra.mxu1 %v2513_v33 }
0x1122   :  { %v1921_v62 = vadd.f32 %v1917_v44, %v3252_v36  ;;  %v1924_v63 = vsel %vm69_vm0, %v1920_v48, 0.0  ;;  %v1932_v5 = vmul.f32 %v1920_v48, %v1920_v48  ;;  %2447 = vmatprep.subr.bf16.mxu1 %v2631_v9 }
0x1123   :  { %1925 = vadd.xlane.f32.xlu0 %v1924_v63 }
0x1124   :  { %v1927_v6 = vsel %vm69_vm0, %v1921_v62, 0.0  ;;  %v1933_v7 = vmul.f32 %v1921_v62, %v1921_v62  ;;  %v1934_v11 = vsel %vm69_vm0, %v1932_v5, 0.0 }
0x1125   :  { %1928 = vadd.xlane.f32.xlu1 %v1927_v6 }
0x1126   :  { %v1937_v56 = vsel %vm69_vm0, %v1933_v7, 0.0 }
0x1127   :  { %1935 = vadd.xlane.f32.xlu0 %v1934_v11 }
0x1129   :  { %1938 = vadd.xlane.f32.xlu1 %v1937_v56 }
0x113a   :  { %2037 = vrot.lane.b32.xlu1 %v3066_v57, %s2635_s14  ;;  %v2514_v57 = vld [vmem:[%s3397_s17 + $0x8] sm:$0xff]  }
0x113b   :  { %2448 = vmatpush3.bf16.msra.mxu1 %v2514_v57 }
0x113d   :  { %2035 = vrot.lane.b32.xlu0 %v3060_v51, %s2635_s14 }
0x113e   :  { %2043 = vrot.lane.b32.xlu1 %v3288_v13, %s2633_s27 }
0x1141   :  { %2051 = vrot.lane.b32.xlu0 %v1914_v0, %s2634_s23 }
0x1142   :  { %2045 = vrot.lane.b32.xlu1 %v3290_v2, %s2633_s27 }
0x1146   :  { %2053 = vrot.lane.b32.xlu1 %v1917_v44, %s2634_s23 }
0x11b0   :  { %v1926_v51 = vpop.xlane.xlu0 %1925 }
0x11b1   :  { %v1930_v36 = vmul.f32 0.03125, %v1926_v51 }
0x11b2   :  { %v1929_v60 = vpop.xlane.xlu1 %1928 }
0x11b3   :  { %v1931_v39 = vmul.f32 0.03125, %v1929_v60  ;;  %v1942_v35 = vmul.f32 %v1930_v36, %v1930_v36  ;;  %v1946_v16 = vsub.f32 %v1920_v48, %v1930_v36 }
0x11b4   :  { %v1936_v40 = vpop.xlane.xlu0 %1935 }
0x11b5   :  { %v1940_v45 = vmul.f32 0.03125, %v1936_v40  ;;  %v1943_v50 = vmul.f32 %v1931_v39, %v1931_v39  ;;  %v1947_v37 = vsub.f32 %v1921_v62, %v1931_v39 }
0x11b6   :  { %v1939_v49 = vpop.xlane.xlu1 %1938 }
0x11b7   :  { %v1944_v52 = vsub.f32 %v1940_v45, %v1942_v35  ;;  %v1941_v54 = vmul.f32 0.03125, %v1939_v49 }
0x11b8   :  { %v2036_v3 = vpop.permute.xlu0 %2035 }
0x11b9   :  { %v1948_v53 = vadd.f32 1e-05, %v1944_v52  ;;  %v1945_v26 = vsub.f32 %v1941_v54, %v1943_v50  ;;  %v2057_v9 = vsel %vm69_vm0, %v3019_v20, %v2036_v3  ;;  %v2185_v20 = vld [vmem:[%s3395_s15] ss:$0 sm:$0xff]  ;;  %s2636_s15 = smov [#allocation2]  }
0x11ba   :  { %v2038_v38 = vpop.permute.xlu1 %2037  ;;  %s2072_s10 = sshll.u32 %s2636_s15, 4  ;;  %s2073_s10 = int_to_ptr.vmem [resolvable:$true] %s2072_s10 }
0x11bb   :  { %2603 = vrsqrt.f32 %v1948_v53  ;;  %v1949_v4 = vadd.f32 1e-05, %v1945_v26  ;;  %v2058_v17 = vsel %vm69_vm0, %v3021_v21, %v2038_v38  ;;  %v2186_v21 = vld [vmem:[%s3396_s16] ss:$0 sm:$0xff]  ;;  %p2612_p1 = scmp.lt.s32.totalorder %s2073_s10, %s2073_s10 }
0x11bc   :  { %v2052_v13 = vpop.permute.xlu0 %2051 }
0x11bd   :  { %2605 = vrsqrt.f32 %v1949_v4 }
0x11be   :  { %v2044_v10 = vpop.permute.xlu1 %2043 }
0x11bf   :  { %v2060_v2 = vsel %vm2059_vm3, %v2057_v9, %v2044_v10 }
0x11c0   :  { %v2063_v12 = vsel %vm2062_vm4, %v2060_v2, %v2052_v13 }
0x11c1   :  { %2065 = vst [vmem:[%s3399_s19] sm:$0xff] %v2063_v12 }
0x11c2   :  { %v2046_v14 = vpop.permute.xlu1 %2045 }
0x11c3   :  { %v2061_v59 = vsel %vm2059_vm3, %v2058_v17, %v2046_v14 }
0x11c5   :  { %v2604_v18 = vpop.eup %2603 }
0x11c6   :  { %v1952_v19 = vmul.f32 %v2604_v18, %v1946_v16  ;;  %v2054_v22 = vpop.permute.xlu1 %2053 }
0x11c7   :  { %v2606_v24 = vpop.eup %2605  ;;  %v2064_v25 = vsel %vm2062_vm4, %v2061_v59, %v2054_v22 }
0x11c8   :  { %v1953_v28 = vmul.f32 %v2606_v24, %v1947_v37  ;;  %2066 = vst [vmem:[%s3399_s19 + $0x8] sm:$0xff] %v2064_v25  ;;  %v1960_v29 = vmul.f32 %v2185_v20, %v1952_v19  ;;  %s2607_s19 = scalar_lea.vmem %s2073_s10, 256 }
0x11c9   :  { %p2608_p0 = scmp.ne.s32.totalorder %s2073_s10, %s2607_s19  ;;  %p2613_p2 = scmp.lt.s32.totalorder %s2607_s19, %s2607_s19 }
0x11ca   :  { %v1961_v23 = vmul.f32 %v2185_v20, %v1953_v28  ;;  %v1968_v27 = vadd.f32 %v2186_v21, %v1960_v29 }
0x11cb   :  { %p2614_p3 = por %p2613_p2, %p2612_p1 }
0x11cc   :  { %v1969_v15 = vadd.f32 %v2186_v21, %v1961_v23 }
0x11cd   :  { %p2615_p4 = pnand %p2614_p3, %p2608_p0 }
0x11ce   :  { %v1970_v8 = vpack.c.bf16 %v1969_v15, %v1968_v27 }
0x11d0   :  { %2450 = vmatmul.mubr.msk.bf16.vlgmr.msra.gmra.mrb[32].mxu1 %vm69_vm0, %v1970_v8 }
0x12a3   :  { %v2024_v31 = vpop.f32.mrb[32].mxu1 }
0x12a4   :  { %2031 = vst [vmem:[#allocation2] sm:$0xff] %v2024_v31  ;;  %v2451_v30 = vpop.f32.mrb[33].mxu1 }
0x12a5   :  { %v2027_v34 = vpop.f32.mrb[34].mxu1 }
0x12a6   :  { %2032 = vst [vmem:[#allocation2 + $0x8] sm:$0xff] %v2027_v34  ;;  %v2452_v32 = vpop.f32.mrb[35].mxu1 }
0x12a7   :  { %2618 = shalt.err (!%p2615_p4)
}
0x12a8   :  { %s2619_s6 = scalar_lea.hbm %s3398_s18, 256 }
0x12a9   :  { %p2620_p5 = scmp.ne.s32.totalorder %s3398_s18, %s2619_s6  ;;  %p2623_p6 = scmp.lt.u32.totalorder %s2619_s6, %s3398_s18 }
0x12ab   :  { %p2625_p7 = pnand %p2623_p6, %p2620_p5 }
0x12ad   :  { %2628 = shalt.err (!%p2625_p7)
}
0x12ae   :  { %s2637_s7 = smov 128   ;;  %s2638_s8 = smov 8  }
0x12af   :  { %2078 = dma.vmem_to_hbm [thread:$0]  %s2073_s10, 256, %s3398_s18, [#allocation3], %s2637_s7, %s2637_s7, %s2638_s8  }
0x12b0   :  { %2629 = dma.done.wait [#allocation3], 256  }
0x12b1   :  { %2630 = vsyncadd [#allocation3], 4294967040 }
0x12b2   :  { %2086 = vsyncpa [#allocation3], 1 }

</bundles_post_ra>
